<compile_context>
chip_gen: v5e
topology: v5e:2x2
jax: 0.10.0
libtpu: 0.0.40
codegen_flags: <defaults>
</compile_context>

<pallas_src>
import functools

import jax
import jax.numpy as jnp
import numpy as np
from jax.experimental import pallas as pl
from jax.experimental.pallas import tpu as pltpu

KSIZE = 9
PAD = 4            # Conv1d padding=4 (same-length output for k=9)
FRONT = 16         # aligned scratch halo (bf16 sublane-tile height)
C1, C2, C3 = 16, 64, 64


def _leaky(v):
    return jnp.where(v >= 0, v, 0.01 * v)   # nn.LeakyReLU default slope 0.01


def _round_up(x, m):
    return ((x + m - 1) // m) * m


def cnn_kernel(x_ref, w1_ref, b1_ref, w2_ref, b2_ref, w3_ref, b3_ref,
               w4_ref, b4_ref, out_ref, h1e, h2e, *, bt, lp, l_real):
    M = bt * lp                      # flattened (per-sample padded) rows this step

    # mask of "real" (non-pad) rows inside the flattened slab
    pos = jax.lax.broadcasted_iota(jnp.int32, (M, 1), 0) % lp
    interior = (pos >= PAD) & (pos < PAD + l_real)

    x = x_ref[0]                     # (M + 2*PAD, 1) f32: halo + per-sample zero pad

    # ---- layer 1: Conv1d(1 -> 16, k=9)  (Cin=1 -> cheap VPU broadcast FMAs) ----
    w1 = w1_ref[...]                 # (9, 16) f32
    acc1 = jnp.zeros((M, C1), jnp.float32)
    for k in range(KSIZE):
        acc1 = acc1 + x[k:k + M, :] * w1[k:k + 1, :]        # (M,1)*(1,16)
    h1 = jnp.where(interior, _leaky(acc1 + b1_ref[...]), 0.0)

    # stage into bf16 scratch at a 16-row (tile-aligned) offset; only halo rows
    # get explicit zeros, the interior is fully overwritten every step.
    h1e[0:FRONT, :] = jnp.zeros((FRONT, C1), jnp.bfloat16)
    h1e[FRONT + M:2 * FRONT + M, :] = jnp.zeros((FRONT, C1), jnp.bfloat16)
    h1e[FRONT:FRONT + M, :] = h1.astype(jnp.bfloat16)

    # ---- layer 2: Conv1d(16 -> 64, k=9) as one bf16 (M,144)@(144,64) matmul ----
    cols2 = jnp.concatenate(
        [h1e[FRONT - PAD + k:FRONT - PAD + k + M, :] for k in range(KSIZE)], axis=-1)
    h2 = jnp.where(
        interior,
        _leaky(jnp.dot(cols2, w2_ref[...], preferred_element_type=jnp.float32)
               + b2_ref[...]),
        0.0)

    h2e[0:FRONT, :] = jnp.zeros((FRONT, C2), jnp.bfloat16)
    h2e[FRONT + M:2 * FRONT + M, :] = jnp.zeros((FRONT, C2), jnp.bfloat16)
    h2e[FRONT:FRONT + M, :] = h2.astype(jnp.bfloat16)

    # ---- layer 3: Conv1d(64 -> 64, k=9) as one bf16 (M,576)@(576,64) matmul ----
    cols3 = jnp.concatenate(
        [h2e[FRONT - PAD + k:FRONT - PAD + k + M, :] for k in range(KSIZE)], axis=-1)
    h3 = _leaky(jnp.dot(cols3, w3_ref[...], preferred_element_type=jnp.float32)
                + b3_ref[...])                               # (M, 64) f32

    # ---- head: AdaptiveAvgPool1d(1) + Conv1d(64->1, k=1) + sigmoid ----
    # masked per-sample mean over the length axis (lp % 8 == 0 so the reshape is
    # a free leading-dim split; the sum is a sublane reduction, no pool matmul)
    h3m = jnp.where(interior, h3, 0.0)
    pooled = jnp.sum(h3m.reshape(bt, lp, C3), axis=1) * (1.0 / l_real)   # (bt, 64)
    y = jnp.dot(pooled, w4_ref[...], preferred_element_type=jnp.float32) + b4_ref[...]
    out_ref[...] = (1.0 / (1.0 + jnp.exp(-y))).reshape(1, bt, 1)


def _pick_block_b(batch, lp, target_rows=4096):
    """Samples per grid step: biggest slab <= target_rows rows, but keep >= 2
    (preferably an even number of) grid steps so both v7x TensorCores get work."""
    bt = max(1, target_rows // lp)
    if bt >= batch:
        bt = pl.cdiv(batch, 2) if batch > 1 else 1
    g = pl.cdiv(batch, bt)
    if g > 1 and g % 2 == 1:
        bt_alt = pl.cdiv(batch, g + 1)
        if bt_alt >= 1 and pl.cdiv(batch, bt_alt) % 2 == 0:
            bt = bt_alt
    return bt


def cnn_forward(x, params, block_b=None, target_rows=4096):
    """x: (B, features) float32 -> (B, 1) float32 (same as the PyTorch module)."""
    w1, b1, w2, b2, w3, b3, w4, b4 = params
    B, L = x.shape
    lp = _round_up(L + 2 * PAD, 8)          # per-sample padded length, 8-aligned
    extra = lp - (L + 2 * PAD)
    if block_b is None:
        block_b = _pick_block_b(B, lp, target_rows)
    G = pl.cdiv(B, block_b)
    Bp = G * block_b                        # zero-pad batch to a multiple of block_b
    M = block_b * lp
    Mp = M + 2 * PAD

    # Host-side layout plumbing (free): batch pad, per-sample zero pad (front PAD,
    # back PAD+extra), flatten each block of `block_b` samples, add a PAD-row halo
    # so every conv window is a static in-bounds slice inside the kernel.
    xf = x.astype(jnp.float32)
    if Bp != B:
        xf = jnp.pad(xf, ((0, Bp - B), (0, 0)))
    x_pad = jnp.pad(xf, ((0, 0), (PAD, PAD + extra)))              # (Bp, lp)
    x_ext = jnp.pad(x_pad.reshape(G, M), ((0, 0), (PAD, PAD)))     # (G, Mp)
    x_ext = x_ext.reshape(G, Mp, 1)

    # Flatten conv weights for the fused im2col matmuls; bf16 for the MXU.
    w1r = w1.reshape(KSIZE, C1).astype(jnp.float32)
    w2f = w2.reshape(KSIZE * C1, C2).astype(jnp.bfloat16)
    w3f = w3.reshape(KSIZE * C2, C3).astype(jnp.bfloat16)
    b1f = b1.astype(jnp.float32)
    b2f = b2.astype(jnp.float32)
    b3f = b3.astype(jnp.float32)
    w4f = w4.astype(jnp.float32)
    b4f = b4.astype(jnp.float32)

    kernel = functools.partial(cnn_kernel, bt=block_b, lp=lp, l_real=L)

    out = pl.pallas_call(
        kernel,
        out_shape=jax.ShapeDtypeStruct((G, block_b, 1), jnp.float32),
        grid_spec=pltpu.PrefetchScalarGridSpec(
            num_scalar_prefetch=0,
            grid=(G,),
            in_specs=[
                pl.BlockSpec((1, Mp, 1), lambda g: (g, 0, 0)),        # x_ext
                pl.BlockSpec((KSIZE, C1), lambda g: (0, 0)),          # w1 (9,16) f32
                pl.BlockSpec((1, C1), lambda g: (0, 0)),              # b1
                pl.BlockSpec((KSIZE * C1, C2), lambda g: (0, 0)),     # w2 (144,64) bf16
                pl.BlockSpec((1, C2), lambda g: (0, 0)),              # b2
                pl.BlockSpec((KSIZE * C2, C3), lambda g: (0, 0)),     # w3 (576,64) bf16
                pl.BlockSpec((1, C3), lambda g: (0, 0)),              # b3
                pl.BlockSpec((C3, 1), lambda g: (0, 0)),              # w4
                pl.BlockSpec((1, 1), lambda g: (0, 0)),               # b4
            ],
            out_specs=pl.BlockSpec((1, block_b, 1), lambda g: (g, 0, 0)),
            scratch_shapes=[
                pltpu.VMEM((2 * FRONT + M, C1), jnp.bfloat16),   # halo'd layer-1 acts
                pltpu.VMEM((2 * FRONT + M, C2), jnp.bfloat16),   # halo'd layer-2 acts
            ],
        ),
        compiler_params=pltpu.CompilerParams(
            dimension_semantics=("parallel",),
            vmem_limit_bytes=48 * 1024 * 1024),
    )(x_ext, w1r, b1f, w2f, b2f, w3f, b3f, w4f, b4f)
    return out.reshape(Bp, 1)[:B]


def ref_forward(x, params):
    """Pure-JAX f32 reference with identical math (for validation)."""
    w1, b1, w2, b2, w3, b3, w4, b4 = params
    B, L = x.shape
    h = x.reshape(B, L, 1).astype(jnp.float32)

    def conv_same(h, w, b):
        _, Ln, _ = h.shape
        cout = w.shape[-1]
        hp = jnp.pad(h, ((0, 0), (PAD, PAD), (0, 0)))
        acc = jnp.zeros((B, Ln, cout), jnp.float32)
        for k in range(KSIZE):
            acc = acc + jnp.einsum('blc,cd->bld', hp[:, k:k + Ln, :], w[k])
        return acc + b.reshape(1, 1, cout)

    h = _leaky(conv_same(h, w1, b1))
    h = _leaky(conv_same(h, w2, b2))
    h = _leaky(conv_same(h, w3, b3))
    pooled = jnp.mean(h, axis=1)                 # (B,64)  == AdaptiveAvgPool1d(1)
    y = pooled @ w4 + b4                         # (B,1)
    return 1.0 / (1.0 + jnp.exp(-y))


def init_params(key):
    ks = jax.random.split(key, 8)
    scale = 0.1
    w1 = scale * jax.random.normal(ks[0], (KSIZE, 1, C1), jnp.float32)
    b1 = scale * jax.random.normal(ks[1], (1, C1), jnp.float32)
    w2 = scale * jax.random.normal(ks[2], (KSIZE, C1, C2), jnp.float32)
    b2 = scale * jax.random.normal(ks[3], (1, C2), jnp.float32)
    w3 = scale * jax.random.normal(ks[4], (KSIZE, C2, C3), jnp.float32)
    b3 = scale * jax.random.normal(ks[5], (1, C3), jnp.float32)
    w4 = scale * jax.random.normal(ks[6], (C3, 1), jnp.float32)
    b4 = scale * jax.random.normal(ks[7], (1, 1), jnp.float32)
    return (w1, b1, w2, b2, w3, b3, w4, b4)


if __name__ == "__main__":
    key = jax.random.PRNGKey(0)
    k_param, k_x = jax.random.split(key)

    B, FEATURES = 2, 16                     # x: (batch, features), as in forward()
    params = init_params(k_param)
    x = jax.random.normal(k_x, (B, FEATURES), jnp.float32)

    ref = jax.block_until_ready(ref_forward(x, params))

    # default block picker: keeps >= 2 grid steps (one sample per step here)
    out = jax.block_until_ready(cnn_forward(x, params))
    # bf16 MXU operands -> compare against the f32 reference with a loose tolerance
    np.testing.assert_allclose(np.asarray(out), np.asarray(ref),
                               rtol=2e-2, atol=2e-2)
    assert out.shape == (B, 1)

    # also exercise the multi-sample-per-step (flattened batch block) path
    out2 = jax.block_until_ready(cnn_forward(x, params, block_b=2))
    np.testing.assert_allclose(np.asarray(out2), np.asarray(ref),
                               rtol=2e-2, atol=2e-2)

    print("KERNEL_OK")
</pallas_src>

<mosaic_0001>
module attributes {stable_mosaic.version = 11 : i64} {
  func.func @cnn_kernel(%arg0: i32, %arg1: memref<1x32x1xf32, #tpu.memory_space<vmem>>, %arg2: memref<9x16xf32, #tpu.memory_space<vmem>>, %arg3: memref<1x16xf32, #tpu.memory_space<vmem>>, %arg4: memref<144x64xbf16, #tpu.memory_space<vmem>>, %arg5: memref<1x64xf32, #tpu.memory_space<vmem>>, %arg6: memref<576x64xbf16, #tpu.memory_space<vmem>>, %arg7: memref<1x64xf32, #tpu.memory_space<vmem>>, %arg8: memref<64x1xf32, #tpu.memory_space<vmem>>, %arg9: memref<1x1xf32, #tpu.memory_space<vmem>>, %arg10: memref<1x1x1xf32, #tpu.memory_space<vmem>>, %arg11: memref<56x16xbf16, #tpu.memory_space<vmem>>, %arg12: memref<56x64xbf16, #tpu.memory_space<vmem>>) attributes {dimension_semantics = [#tpu.dimension_semantics<parallel>], iteration_bounds = array<i64: 2>, scalar_prefetch = 0 : i64, scratch_operands = 2 : i64, tpu.core_type = #tpu.core_type<tc>, window_params = [{transform_indices = @transform_0, window_bounds = array<i64: 1, 32, 1>}, {pipeline_mode = #tpu.pipeline_mode<synchronous>, transform_indices = @transform_1, window_bounds = array<i64: 9, 16>}, {pipeline_mode = #tpu.pipeline_mode<synchronous>, transform_indices = @transform_2, window_bounds = array<i64: 1, 16>}, {pipeline_mode = #tpu.pipeline_mode<synchronous>, transform_indices = @transform_3, window_bounds = array<i64: 144, 64>}, {pipeline_mode = #tpu.pipeline_mode<synchronous>, transform_indices = @transform_4, window_bounds = array<i64: 1, 64>}, {pipeline_mode = #tpu.pipeline_mode<synchronous>, transform_indices = @transform_5, window_bounds = array<i64: 576, 64>}, {pipeline_mode = #tpu.pipeline_mode<synchronous>, transform_indices = @transform_6, window_bounds = array<i64: 1, 64>}, {pipeline_mode = #tpu.pipeline_mode<synchronous>, transform_indices = @transform_7, window_bounds = array<i64: 64, 1>}, {pipeline_mode = #tpu.pipeline_mode<synchronous>, transform_indices = @transform_8, window_bounds = array<i64: 1, 1>}, {transform_indices = @transform_9, window_bounds = array<i64: 1, 1, 1>}]} {
    %0 = tpu.iota {dimensions = array<i32: 0>} : vector<24x1xi32>
    %c24_i32 = arith.constant 24 : i32
    %c0_i32 = arith.constant 0 : i32
    %1 = arith.cmpi eq, %c24_i32, %c0_i32 : i32
    %c1_i32 = arith.constant 1 : i32
    %2 = arith.select %1, %c1_i32, %c24_i32 : i32
    %3 = vector.broadcast %2 : i32 to vector<24x1xi32>
    %4 = arith.remsi %0, %3 : vector<24x1xi32>
    %c0_i32_0 = arith.constant 0 : i32
    %5 = vector.broadcast %c0_i32_0 : i32 to vector<24x1xi32>
    %6 = arith.cmpi ne, %4, %5 : vector<24x1xi32>
    %c0_i32_1 = arith.constant 0 : i32
    %7 = vector.broadcast %c0_i32_1 : i32 to vector<24x1xi32>
    %8 = arith.cmpi slt, %4, %7 : vector<24x1xi32>
    %c0_i32_2 = arith.constant 0 : i32
    %9 = arith.cmpi slt, %2, %c0_i32_2 : i32
    %10 = vector.broadcast %9 : i1 to vector<24x1xi1>
    %11 = vector.broadcast %10 : vector<24x1xi1> to vector<24x1xi1>
    %12 = arith.xori %8, %11 : vector<24x1xi1>
    %13 = arith.andi %12, %6 : vector<24x1xi1>
    %14 = vector.broadcast %2 : i32 to vector<24x1xi32>
    %15 = arith.addi %4, %14 : vector<24x1xi32>
    %16 = arith.select %13, %15, %4 : vector<24x1xi1>, vector<24x1xi32>
    %c4_i32 = arith.constant 4 : i32
    %17 = vector.broadcast %c4_i32 : i32 to vector<24x1xi32>
    %18 = arith.cmpi sge, %16, %17 : vector<24x1xi32>
    %c20_i32 = arith.constant 20 : i32
    %19 = vector.broadcast %c20_i32 : i32 to vector<24x1xi32>
    %20 = arith.cmpi slt, %16, %19 : vector<24x1xi32>
    %21 = arith.andi %18, %20 : vector<24x1xi1>
    %c0 = arith.constant 0 : index
    %c0_3 = arith.constant 0 : index
    %c0_4 = arith.constant 0 : index
    %22 = vector.load %arg1[%c0, %c0_3, %c0_4] : memref<1x32x1xf32, #tpu.memory_space<vmem>>, vector<1x32x1xf32>
    %23 = vector.shape_cast %22 : vector<1x32x1xf32> to vector<32x1xf32>
    %c0_5 = arith.constant 0 : index
    %c0_6 = arith.constant 0 : index
    %24 = vector.load %arg2[%c0_5, %c0_6] : memref<9x16xf32, #tpu.memory_space<vmem>>, vector<9x16xf32>
    %cst = arith.constant 0.000000e+00 : f32
    %25 = vector.broadcast %cst : f32 to vector<24x16xf32>
    %26 = vector.extract_strided_slice %23 {offsets = [0, 0], sizes = [24, 1], strides = [1, 1]} : vector<32x1xf32> to vector<24x1xf32>
    %27 = vector.extract_strided_slice %24 {offsets = [0, 0], sizes = [1, 16], strides = [1, 1]} : vector<9x16xf32> to vector<1x16xf32>
    %28 = vector.broadcast %26 : vector<24x1xf32> to vector<24x16xf32>
    %29 = vector.broadcast %27 : vector<1x16xf32> to vector<24x16xf32>
    %30 = arith.mulf %28, %29 : vector<24x16xf32>
    %31 = arith.addf %25, %30 : vector<24x16xf32>
    %32 = vector.extract_strided_slice %23 {offsets = [1, 0], sizes = [24, 1], strides = [1, 1]} : vector<32x1xf32> to vector<24x1xf32>
    %33 = vector.extract_strided_slice %24 {offsets = [1, 0], sizes = [1, 16], strides = [1, 1]} : vector<9x16xf32> to vector<1x16xf32>
    %34 = vector.broadcast %32 : vector<24x1xf32> to vector<24x16xf32>
    %35 = vector.broadcast %33 : vector<1x16xf32> to vector<24x16xf32>
    %36 = arith.mulf %34, %35 : vector<24x16xf32>
    %37 = arith.addf %31, %36 : vector<24x16xf32>
    %38 = vector.extract_strided_slice %23 {offsets = [2, 0], sizes = [24, 1], strides = [1, 1]} : vector<32x1xf32> to vector<24x1xf32>
    %39 = vector.extract_strided_slice %24 {offsets = [2, 0], sizes = [1, 16], strides = [1, 1]} : vector<9x16xf32> to vector<1x16xf32>
    %40 = vector.broadcast %38 : vector<24x1xf32> to vector<24x16xf32>
    %41 = vector.broadcast %39 : vector<1x16xf32> to vector<24x16xf32>
    %42 = arith.mulf %40, %41 : vector<24x16xf32>
    %43 = arith.addf %37, %42 : vector<24x16xf32>
    %44 = vector.extract_strided_slice %23 {offsets = [3, 0], sizes = [24, 1], strides = [1, 1]} : vector<32x1xf32> to vector<24x1xf32>
    %45 = vector.extract_strided_slice %24 {offsets = [3, 0], sizes = [1, 16], strides = [1, 1]} : vector<9x16xf32> to vector<1x16xf32>
    %46 = vector.broadcast %44 : vector<24x1xf32> to vector<24x16xf32>
    %47 = vector.broadcast %45 : vector<1x16xf32> to vector<24x16xf32>
    %48 = arith.mulf %46, %47 : vector<24x16xf32>
    %49 = arith.addf %43, %48 : vector<24x16xf32>
    %50 = vector.extract_strided_slice %23 {offsets = [4, 0], sizes = [24, 1], strides = [1, 1]} : vector<32x1xf32> to vector<24x1xf32>
    %51 = vector.extract_strided_slice %24 {offsets = [4, 0], sizes = [1, 16], strides = [1, 1]} : vector<9x16xf32> to vector<1x16xf32>
    %52 = vector.broadcast %50 : vector<24x1xf32> to vector<24x16xf32>
    %53 = vector.broadcast %51 : vector<1x16xf32> to vector<24x16xf32>
    %54 = arith.mulf %52, %53 : vector<24x16xf32>
    %55 = arith.addf %49, %54 : vector<24x16xf32>
    %56 = vector.extract_strided_slice %23 {offsets = [5, 0], sizes = [24, 1], strides = [1, 1]} : vector<32x1xf32> to vector<24x1xf32>
    %57 = vector.extract_strided_slice %24 {offsets = [5, 0], sizes = [1, 16], strides = [1, 1]} : vector<9x16xf32> to vector<1x16xf32>
    %58 = vector.broadcast %56 : vector<24x1xf32> to vector<24x16xf32>
    %59 = vector.broadcast %57 : vector<1x16xf32> to vector<24x16xf32>
    %60 = arith.mulf %58, %59 : vector<24x16xf32>
    %61 = arith.addf %55, %60 : vector<24x16xf32>
    %62 = vector.extract_strided_slice %23 {offsets = [6, 0], sizes = [24, 1], strides = [1, 1]} : vector<32x1xf32> to vector<24x1xf32>
    %63 = vector.extract_strided_slice %24 {offsets = [6, 0], sizes = [1, 16], strides = [1, 1]} : vector<9x16xf32> to vector<1x16xf32>
    %64 = vector.broadcast %62 : vector<24x1xf32> to vector<24x16xf32>
    %65 = vector.broadcast %63 : vector<1x16xf32> to vector<24x16xf32>
    %66 = arith.mulf %64, %65 : vector<24x16xf32>
    %67 = arith.addf %61, %66 : vector<24x16xf32>
    %68 = vector.extract_strided_slice %23 {offsets = [7, 0], sizes = [24, 1], strides = [1, 1]} : vector<32x1xf32> to vector<24x1xf32>
    %69 = vector.extract_strided_slice %24 {offsets = [7, 0], sizes = [1, 16], strides = [1, 1]} : vector<9x16xf32> to vector<1x16xf32>
    %70 = vector.broadcast %68 : vector<24x1xf32> to vector<24x16xf32>
    %71 = vector.broadcast %69 : vector<1x16xf32> to vector<24x16xf32>
    %72 = arith.mulf %70, %71 : vector<24x16xf32>
    %73 = arith.addf %67, %72 : vector<24x16xf32>
    %74 = vector.extract_strided_slice %23 {offsets = [8, 0], sizes = [24, 1], strides = [1, 1]} : vector<32x1xf32> to vector<24x1xf32>
    %75 = vector.extract_strided_slice %24 {offsets = [8, 0], sizes = [1, 16], strides = [1, 1]} : vector<9x16xf32> to vector<1x16xf32>
    %76 = vector.broadcast %74 : vector<24x1xf32> to vector<24x16xf32>
    %77 = vector.broadcast %75 : vector<1x16xf32> to vector<24x16xf32>
    %78 = arith.mulf %76, %77 : vector<24x16xf32>
    %79 = arith.addf %73, %78 : vector<24x16xf32>
    %c0_7 = arith.constant 0 : index
    %c0_8 = arith.constant 0 : index
    %80 = vector.load %arg3[%c0_7, %c0_8] : memref<1x16xf32, #tpu.memory_space<vmem>>, vector<1x16xf32>
    %81 = vector.broadcast %80 : vector<1x16xf32> to vector<24x16xf32>
    %82 = arith.addf %79, %81 : vector<24x16xf32>
    %cst_9 = arith.constant 0.000000e+00 : f32
    %83 = vector.broadcast %cst_9 : f32 to vector<24x16xf32>
    %84 = arith.cmpf oge, %82, %83 : vector<24x16xf32>
    %cst_10 = arith.constant 0.00999999977 : f32
    %85 = vector.broadcast %cst_10 : f32 to vector<24x16xf32>
    %86 = arith.mulf %85, %82 : vector<24x16xf32>
    %87 = arith.select %84, %82, %86 : vector<24x16xi1>, vector<24x16xf32>
    %cst_11 = arith.constant 0.000000e+00 : f32
    %88 = vector.shape_cast %21 : vector<24x1xi1> to vector<24x1xi1>
    %89 = vector.broadcast %88 : vector<24x1xi1> to vector<24x16xi1>
    %90 = vector.broadcast %cst_11 : f32 to vector<24x16xf32>
    %91 = arith.select %89, %87, %90 : vector<24x16xi1>, vector<24x16xf32>
    %cst_12 = arith.constant 0.000000e+00 : bf16
    %92 = vector.broadcast %cst_12 : bf16 to vector<16x16xbf16>
    %c0_13 = arith.constant 0 : index
    %c0_14 = arith.constant 0 : index
    %93 = vector.load %arg11[%c0_13, %c0_14] : memref<56x16xbf16, #tpu.memory_space<vmem>>, vector<16x16xbf16>
    tpu.vector_store %arg11[%c0_13, %c0_14], %92 {strides = array<i32>} : memref<56x16xbf16, #tpu.memory_space<vmem>>, vector<16x16xbf16>,
    %cst_15 = arith.constant 0.000000e+00 : bf16
    %94 = vector.broadcast %cst_15 : bf16 to vector<16x16xbf16>
    %c40 = arith.constant 40 : index
    %c0_16 = arith.constant 0 : index
    %95 = vector.load %arg11[%c40, %c0_16] : memref<56x16xbf16, #tpu.memory_space<vmem>>, vector<16x16xbf16>
    tpu.vector_store %arg11[%c40, %c0_16], %94 {strides = array<i32>} : memref<56x16xbf16, #tpu.memory_space<vmem>>, vector<16x16xbf16>,
    %96 = arith.truncf %91 : vector<24x16xf32> to vector<24x16xbf16>
    %c16 = arith.constant 16 : index
    %c0_17 = arith.constant 0 : index
    %97 = vector.load %arg11[%c16, %c0_17] : memref<56x16xbf16, #tpu.memory_space<vmem>>, vector<24x16xbf16>
    tpu.vector_store %arg11[%c16, %c0_17], %96 {strides = array<i32>} : memref<56x16xbf16, #tpu.memory_space<vmem>>, vector<24x16xbf16>,
    %c12 = arith.constant 12 : index
    %c0_18 = arith.constant 0 : index
    %98 = vector.load %arg11[%c12, %c0_18] : memref<56x16xbf16, #tpu.memory_space<vmem>>, vector<24x16xbf16>
    %c13 = arith.constant 13 : index
    %c0_19 = arith.constant 0 : index
    %99 = vector.load %arg11[%c13, %c0_19] : memref<56x16xbf16, #tpu.memory_space<vmem>>, vector<24x16xbf16>
    %c14 = arith.constant 14 : index
    %c0_20 = arith.constant 0 : index
    %100 = vector.load %arg11[%c14, %c0_20] : memref<56x16xbf16, #tpu.memory_space<vmem>>, vector<24x16xbf16>
    %c15 = arith.constant 15 : index
    %c0_21 = arith.constant 0 : index
    %101 = vector.load %arg11[%c15, %c0_21] : memref<56x16xbf16, #tpu.memory_space<vmem>>, vector<24x16xbf16>
    %c16_22 = arith.constant 16 : index
    %c0_23 = arith.constant 0 : index
    %102 = vector.load %arg11[%c16_22, %c0_23] : memref<56x16xbf16, #tpu.memory_space<vmem>>, vector<24x16xbf16>
    %c17 = arith.constant 17 : index
    %c0_24 = arith.constant 0 : index
    %103 = vector.load %arg11[%c17, %c0_24] : memref<56x16xbf16, #tpu.memory_space<vmem>>, vector<24x16xbf16>
    %c18 = arith.constant 18 : index
    %c0_25 = arith.constant 0 : index
    %104 = vector.load %arg11[%c18, %c0_25] : memref<56x16xbf16, #tpu.memory_space<vmem>>, vector<24x16xbf16>
    %c19 = arith.constant 19 : index
    %c0_26 = arith.constant 0 : index
    %105 = vector.load %arg11[%c19, %c0_26] : memref<56x16xbf16, #tpu.memory_space<vmem>>, vector<24x16xbf16>
    %c20 = arith.constant 20 : index
    %c0_27 = arith.constant 0 : index
    %106 = vector.load %arg11[%c20, %c0_27] : memref<56x16xbf16, #tpu.memory_space<vmem>>, vector<24x16xbf16>
    %107 = tpu.concatenate %98, %99, %100, %101, %102, %103, %104, %105, %106 in 1 : vector<24x16xbf16>, vector<24x16xbf16>, vector<24x16xbf16>, vector<24x16xbf16>, vector<24x16xbf16>, vector<24x16xbf16>, vector<24x16xbf16>, vector<24x16xbf16>, vector<24x16xbf16> -> vector<24x144xbf16>
    %c0_28 = arith.constant 0 : index
    %c0_29 = arith.constant 0 : index
    %108 = vector.load %arg4[%c0_28, %c0_29] : memref<144x64xbf16, #tpu.memory_space<vmem>>, vector<144x64xbf16>
    %cst_30 = arith.constant dense<0.000000e+00> : vector<24x64xf32>
    %109 = tpu.matmul %107, %108, %cst_30 {dimension_numbers = #tpu.dot_dimension_numbers<[1], [0], [0], [1], [0, 0, 1, 1], [], []>} : vector<24x144xbf16>, vector<144x64xbf16>, vector<24x64xf32> -> vector<24x64xf32>
    %c0_31 = arith.constant 0 : index
    %c0_32 = arith.constant 0 : index
    %110 = vector.load %arg5[%c0_31, %c0_32] : memref<1x64xf32, #tpu.memory_space<vmem>>, vector<1x64xf32>
    %111 = vector.broadcast %110 : vector<1x64xf32> to vector<24x64xf32>
    %112 = arith.addf %109, %111 : vector<24x64xf32>
    %cst_33 = arith.constant 0.000000e+00 : f32
    %113 = vector.broadcast %cst_33 : f32 to vector<24x64xf32>
    %114 = arith.cmpf oge, %112, %113 : vector<24x64xf32>
    %cst_34 = arith.constant 0.00999999977 : f32
    %115 = vector.broadcast %cst_34 : f32 to vector<24x64xf32>
    %116 = arith.mulf %115, %112 : vector<24x64xf32>
    %117 = arith.select %114, %112, %116 : vector<24x64xi1>, vector<24x64xf32>
    %cst_35 = arith.constant 0.000000e+00 : f32
    %118 = vector.shape_cast %21 : vector<24x1xi1> to vector<24x1xi1>
    %119 = vector.broadcast %118 : vector<24x1xi1> to vector<24x64xi1>
    %120 = vector.broadcast %cst_35 : f32 to vector<24x64xf32>
    %121 = arith.select %119, %117, %120 : vector<24x64xi1>, vector<24x64xf32>
    %cst_36 = arith.constant 0.000000e+00 : bf16
    %122 = vector.broadcast %cst_36 : bf16 to vector<16x64xbf16>
    %c0_37 = arith.constant 0 : index
    %c0_38 = arith.constant 0 : index
    %123 = vector.load %arg12[%c0_37, %c0_38] : memref<56x64xbf16, #tpu.memory_space<vmem>>, vector<16x64xbf16>
    tpu.vector_store %arg12[%c0_37, %c0_38], %122 {strides = array<i32>} : memref<56x64xbf16, #tpu.memory_space<vmem>>, vector<16x64xbf16>,
    %cst_39 = arith.constant 0.000000e+00 : bf16
    %124 = vector.broadcast %cst_39 : bf16 to vector<16x64xbf16>
    %c40_40 = arith.constant 40 : index
    %c0_41 = arith.constant 0 : index
    %125 = vector.load %arg12[%c40_40, %c0_41] : memref<56x64xbf16, #tpu.memory_space<vmem>>, vector<16x64xbf16>
    tpu.vector_store %arg12[%c40_40, %c0_41], %124 {strides = array<i32>} : memref<56x64xbf16, #tpu.memory_space<vmem>>, vector<16x64xbf16>,
    %126 = arith.truncf %121 : vector<24x64xf32> to vector<24x64xbf16>
    %c16_42 = arith.constant 16 : index
    %c0_43 = arith.constant 0 : index
    %127 = vector.load %arg12[%c16_42, %c0_43] : memref<56x64xbf16, #tpu.memory_space<vmem>>, vector<24x64xbf16>
    tpu.vector_store %arg12[%c16_42, %c0_43], %126 {strides = array<i32>} : memref<56x64xbf16, #tpu.memory_space<vmem>>, vector<24x64xbf16>,
    %c12_44 = arith.constant 12 : index
    %c0_45 = arith.constant 0 : index
    %128 = vector.load %arg12[%c12_44, %c0_45] : memref<56x64xbf16, #tpu.memory_space<vmem>>, vector<24x64xbf16>
    %c13_46 = arith.constant 13 : index
    %c0_47 = arith.constant 0 : index
    %129 = vector.load %arg12[%c13_46, %c0_47] : memref<56x64xbf16, #tpu.memory_space<vmem>>, vector<24x64xbf16>
    %c14_48 = arith.constant 14 : index
    %c0_49 = arith.constant 0 : index
    %130 = vector.load %arg12[%c14_48, %c0_49] : memref<56x64xbf16, #tpu.memory_space<vmem>>, vector<24x64xbf16>
    %c15_50 = arith.constant 15 : index
    %c0_51 = arith.constant 0 : index
    %131 = vector.load %arg12[%c15_50, %c0_51] : memref<56x64xbf16, #tpu.memory_space<vmem>>, vector<24x64xbf16>
    %c16_52 = arith.constant 16 : index
    %c0_53 = arith.constant 0 : index
    %132 = vector.load %arg12[%c16_52, %c0_53] : memref<56x64xbf16, #tpu.memory_space<vmem>>, vector<24x64xbf16>
    %c17_54 = arith.constant 17 : index
    %c0_55 = arith.constant 0 : index
    %133 = vector.load %arg12[%c17_54, %c0_55] : memref<56x64xbf16, #tpu.memory_space<vmem>>, vector<24x64xbf16>
    %c18_56 = arith.constant 18 : index
    %c0_57 = arith.constant 0 : index
    %134 = vector.load %arg12[%c18_56, %c0_57] : memref<56x64xbf16, #tpu.memory_space<vmem>>, vector<24x64xbf16>
    %c19_58 = arith.constant 19 : index
    %c0_59 = arith.constant 0 : index
    %135 = vector.load %arg12[%c19_58, %c0_59] : memref<56x64xbf16, #tpu.memory_space<vmem>>, vector<24x64xbf16>
    %c20_60 = arith.constant 20 : index
    %c0_61 = arith.constant 0 : index
    %136 = vector.load %arg12[%c20_60, %c0_61] : memref<56x64xbf16, #tpu.memory_space<vmem>>, vector<24x64xbf16>
    %137 = tpu.concatenate %128, %129, %130, %131, %132, %133, %134, %135, %136 in 1 : vector<24x64xbf16>, vector<24x64xbf16>, vector<24x64xbf16>, vector<24x64xbf16>, vector<24x64xbf16>, vector<24x64xbf16>, vector<24x64xbf16>, vector<24x64xbf16>, vector<24x64xbf16> -> vector<24x576xbf16>
    %c0_62 = arith.constant 0 : index
    %c0_63 = arith.constant 0 : index
    %138 = vector.load %arg6[%c0_62, %c0_63] : memref<576x64xbf16, #tpu.memory_space<vmem>>, vector<576x64xbf16>
    %cst_64 = arith.constant dense<0.000000e+00> : vector<24x64xf32>
    %139 = tpu.matmul %137, %138, %cst_64 {dimension_numbers = #tpu.dot_dimension_numbers<[1], [0], [0], [1], [0, 0, 1, 1], [], []>} : vector<24x576xbf16>, vector<576x64xbf16>, vector<24x64xf32> -> vector<24x64xf32>
    %c0_65 = arith.constant 0 : index
    %c0_66 = arith.constant 0 : index
    %140 = vector.load %arg7[%c0_65, %c0_66] : memref<1x64xf32, #tpu.memory_space<vmem>>, vector<1x64xf32>
    %141 = vector.broadcast %140 : vector<1x64xf32> to vector<24x64xf32>
    %142 = arith.addf %139, %141 : vector<24x64xf32>
    %cst_67 = arith.constant 0.000000e+00 : f32
    %143 = vector.broadcast %cst_67 : f32 to vector<24x64xf32>
    %144 = arith.cmpf oge, %142, %143 : vector<24x64xf32>
    %cst_68 = arith.constant 0.00999999977 : f32
    %145 = vector.broadcast %cst_68 : f32 to vector<24x64xf32>
    %146 = arith.mulf %145, %142 : vector<24x64xf32>
    %147 = arith.select %144, %142, %146 : vector<24x64xi1>, vector<24x64xf32>
    %cst_69 = arith.constant 0.000000e+00 : f32
    %148 = vector.shape_cast %21 : vector<24x1xi1> to vector<24x1xi1>
    %149 = vector.broadcast %148 : vector<24x1xi1> to vector<24x64xi1>
    %150 = vector.broadcast %cst_69 : f32 to vector<24x64xf32>
    %151 = arith.select %149, %147, %150 : vector<24x64xi1>, vector<24x64xf32>
    %152 = vector.shape_cast %151 : vector<24x64xf32> to vector<1x24x64xf32>
    %cst_70 = arith.constant dense<0.000000e+00> : vector<1x64xf32>
    %153 = vector.multi_reduction <add>, %152, %cst_70 [1] : vector<1x24x64xf32> to vector<1x64xf32>
    %cst_71 = arith.constant 6.250000e-02 : f32
    %154 = vector.broadcast %cst_71 : f32 to vector<1x64xf32>
    %155 = arith.mulf %153, %154 : vector<1x64xf32>
    %c0_72 = arith.constant 0 : index
    %c0_73 = arith.constant 0 : index
    %156 = vector.load %arg8[%c0_72, %c0_73] : memref<64x1xf32, #tpu.memory_space<vmem>>, vector<64x1xf32>
    %cst_74 = arith.constant dense<0.000000e+00> : vector<1x1xf32>
    %157 = tpu.matmul %155, %156, %cst_74 {dimension_numbers = #tpu.dot_dimension_numbers<[1], [0], [0], [1], [0, 0, 1, 1], [], []>} : vector<1x64xf32>, vector<64x1xf32>, vector<1x1xf32> -> vector<1x1xf32>
    %c0_75 = arith.constant 0 : index
    %c0_76 = arith.constant 0 : index
    %158 = vector.load %arg9[%c0_75, %c0_76] : memref<1x1xf32, #tpu.memory_space<vmem>>, vector<1x1xf32>
    %159 = arith.addf %157, %158 : vector<1x1xf32>
    %cst_77 = arith.constant 0.000000e+00 : f32
    %160 = vector.broadcast %cst_77 : f32 to vector<1x1xf32>
    %161 = arith.subf %160, %159 : vector<1x1xf32>
    %162 = math.exp %161 : vector<1x1xf32>
    %cst_78 = arith.constant 1.000000e+00 : f32
    %163 = vector.broadcast %cst_78 : f32 to vector<1x1xf32>
    %164 = arith.addf %163, %162 : vector<1x1xf32>
    %cst_79 = arith.constant 1.000000e+00 : f32
    %165 = vector.broadcast %cst_79 : f32 to vector<1x1xf32>
    %166 = arith.divf %165, %164 : vector<1x1xf32>
    %167 = vector.shape_cast %166 : vector<1x1xf32> to vector<1x1x1xf32>
    %c0_80 = arith.constant 0 : index
    %c0_81 = arith.constant 0 : index
    %c0_82 = arith.constant 0 : index
    %168 = vector.load %arg10[%c0_80, %c0_81, %c0_82] : memref<1x1x1xf32, #tpu.memory_space<vmem>>, vector<1x1x1xf32>
    tpu.vector_store %arg10[%c0_80, %c0_81, %c0_82], %167 {strides = array<i32>} : memref<1x1x1xf32, #tpu.memory_space<vmem>>, vector<1x1x1xf32>,
    return
  }
  func.func @transform_0(%arg0: i32) -> (i32, i32, i32) {
    %c0_i32 = arith.constant 0 : i32
    %c0_i32_0 = arith.constant 0 : i32
    %c0_i32_1 = arith.constant 0 : i32
    return %arg0, %c0_i32, %c0_i32_0 : i32, i32, i32
  }
  func.func @transform_1(%arg0: i32) -> (i32, i32) {
    %c0_i32 = arith.constant 0 : i32
    %c0_i32_0 = arith.constant 0 : i32
    %c0_i32_1 = arith.constant 0 : i32
    return %c0_i32, %c0_i32_0 : i32, i32
  }
  func.func @transform_2(%arg0: i32) -> (i32, i32) {
    %c0_i32 = arith.constant 0 : i32
    %c0_i32_0 = arith.constant 0 : i32
    %c0_i32_1 = arith.constant 0 : i32
    return %c0_i32, %c0_i32_0 : i32, i32
  }
  func.func @transform_3(%arg0: i32) -> (i32, i32) {
    %c0_i32 = arith.constant 0 : i32
    %c0_i32_0 = arith.constant 0 : i32
    %c0_i32_1 = arith.constant 0 : i32
    return %c0_i32, %c0_i32_0 : i32, i32
  }
  func.func @transform_4(%arg0: i32) -> (i32, i32) {
    %c0_i32 = arith.constant 0 : i32
    %c0_i32_0 = arith.constant 0 : i32
    %c0_i32_1 = arith.constant 0 : i32
    return %c0_i32, %c0_i32_0 : i32, i32
  }
  func.func @transform_5(%arg0: i32) -> (i32, i32) {
    %c0_i32 = arith.constant 0 : i32
    %c0_i32_0 = arith.constant 0 : i32
    %c0_i32_1 = arith.constant 0 : i32
    return %c0_i32, %c0_i32_0 : i32, i32
  }
  func.func @transform_6(%arg0: i32) -> (i32, i32) {
    %c0_i32 = arith.constant 0 : i32
    %c0_i32_0 = arith.constant 0 : i32
    %c0_i32_1 = arith.constant 0 : i32
    return %c0_i32, %c0_i32_0 : i32, i32
  }
  func.func @transform_7(%arg0: i32) -> (i32, i32) {
    %c0_i32 = arith.constant 0 : i32
    %c0_i32_0 = arith.constant 0 : i32
    %c0_i32_1 = arith.constant 0 : i32
    return %c0_i32, %c0_i32_0 : i32, i32
  }
  func.func @transform_8(%arg0: i32) -> (i32, i32) {
    %c0_i32 = arith.constant 0 : i32
    %c0_i32_0 = arith.constant 0 : i32
    %c0_i32_1 = arith.constant 0 : i32
    return %c0_i32, %c0_i32_0 : i32, i32
  }
  func.func @transform_9(%arg0: i32) -> (i32, i32, i32) {
    %c0_i32 = arith.constant 0 : i32
    %c0_i32_0 = arith.constant 0 : i32
    %c0_i32_1 = arith.constant 0 : i32
    return %arg0, %c0_i32, %c0_i32_0 : i32, i32, i32
  }
}

</mosaic_0001>

<bundles_post_ra>
// kernel: tpu_custom_call.1
= control target key start
LH: loop header
LB: loop body
LE: loop exit
PB: predicated region body
PF: predicated region fallthrough
CT: control target
= control target key end

     0   :  { %s2080_s11 = smov 0   ;;  %s2690_s0 = inlined_call_operand.vmem [shape: f32[2,32,1], index: 0, kind: input, shape index: {}]   ;;  %s2691_s1 = inlined_call_operand.vmem [shape: f32[9,16], index: 1, kind: input, shape index: {}]   ;;  %s2692_s2 = inlined_call_operand.vmem [shape: f32[1,16], index: 2, kind: input, shape index: {}]   ;;  %s2693_s3 = inlined_call_operand.vmem [shape: bf16[144,64], index: 3, kind: input, shape index: {}]   ;;  %s2694_s4 = inlined_call_operand.vmem [shape: f32[1,64], index: 4, kind: input, shape index: {}]   ;;  %s2695_s5 = inlined_call_operand.vmem [shape: bf16[576,64], index: 5, kind: input, shape index: {}]   ;;  %s2696_s6 = inlined_call_operand.vmem [shape: f32[1,64], index: 6, kind: input, shape index: {}]   ;;  %s2697_s7 = inlined_call_operand.vmem [shape: f32[64,1], index: 7, kind: input, shape index: {}]   ;;  %s2698_s8 = inlined_call_operand.<no memory space> [shape: f32[1,1], index: 8, kind: input, shape index: {}]   ;;  %s2699_s9 = inlined_call_operand.vmem [shape: f32[2,1,1], index: 9, kind: output, shape index: {}]  }
   0x1   :  { %v14_v0 = vstv %s2698_s8 }
   0x2   :  { %15 = vst [vmem:[#allocation4] sm:$0x1] %v14_v0 }
   0x3 LB: > { %s1723_s12 = sadd.s32 4294967295, %s2017_s11   ;;  %p1727_p0 = scmp.ge.s32.totalorder %s2017_s11, 1  ;;  %s2017_s11 = sphi %s2080_s11, %s21_s11  }
   0x4   : > { %p289_p1 = scmp.lt.s32.totalorder %s2017_s11, 3 }
   0x6   : > { %p290_p2 = pnand %p1727_p0, %p289_p1 }
   0x7   : > { %p323_p3 = scmp.lt.s32.totalorder (!%p290_p2), %s1723_s12, 1  ;;  %s2020_s24 = smov (!%p290_p2), 64  }
   0x8   : > { %293 = sbr.rel (%p290_p2) target bundleno = 987 (0x3db), region = 56  ;;  %s2021_s25 = smov (!%p290_p2), 80  }
   0x9   : > { %s2022_s26 = smov (!%p290_p2), 96   ;;  %s2023_s27 = smov (!%p290_p2), 32  }
   0xa   : > { %s2024_s28 = smov (!%p290_p2), 16   ;;  %s2025_s29 = smov (!%p290_p2), 48  }
   0xb   : > { %s2026_s30 = smov (!%p290_p2), 112  }
   0xd   : > { %v2019_v1 = vmov 0   ;;  %s2711_s12 = smov (!%p323_p3, %s1723_s12), 1  ;;  %v332_v6 = vlaneseq  ;;  %vm673_vm0 = vcmask 125952   ;;  %v451_v49 = vld [vmem:[%s2691_s1] sm:$0xff]  ;;  %vm489_vm7 = vcmask 1046528  }
   0xe   : > { %2002 = vset.pattern.permute.xlu1 %v2019_v1  ;;  %2001 = vset.pattern.permute.xlu0 %v2019_v1  ;;  %s1917_s8 = sshll.u32 %s2711_s12, 5  ;;  %675 = vst.msk [vmem:[#allocation2 + $0x4] sm:$0xf] %vm673_vm0, %v2019_v1  ;;  %v2128_v55 = vperm.slane %v451_v49, 1  ;;  %v2130_v56 = vperm.slane %v451_v49, 2  ;;  %v2132_v57 = vperm.slane %v451_v49, 3  ;;  %s330_s21 = scalar_lea.vmem %s2699_s9, %s2711_s12 }
   0xf   : > { %s327_s15 = scalar_lea.vmem %s2690_s0, %s1917_s8  ;;  %v2096_v7 = vshrl.u32 %v332_v6, 7  ;;  %676 = vst.msk [vmem:[#allocation2 + $0x14] sm:$0xf] %vm673_vm0, %v2019_v1  ;;  %v2134_v58 = vperm.slane %v451_v49, 4  ;;  %v2136_v59 = vperm.slane %v451_v49, 5  ;;  %v2140_v61 = vperm.slane %v451_v49, 6 }
  0x10   : > { %v449_v2 = vld [vmem:[%s327_s15 + $0x10] sm:$0xff]  ;;  %v447_v3 = vld [vmem:[%s327_s15] sm:$0xff]  ;;  %v450_v4 = vld [vmem:[%s327_s15 + $0x18] sm:$0xff]  ;;  %v2142_v62 = vperm.slane %v451_v49, 7  ;;  %vm512_vm8 = vcmask 1045504   ;;  %vm535_vm9 = vcmask 1044480  }
  0x11   : > { %465 = vperm.xlu1 %2002, %v449_v2   ;;  %455 = vperm.xlu0 %2001, %v447_v3   ;;  %v448_v5 = vld [vmem:[%s327_s15 + $0x8] sm:$0xff]  ;;  %v2099_v8 = vadd.s32 16, %v2096_v7  ;;  %v2104_v11 = vadd.s32 8, %v2096_v7  ;;  %v339_v15 = vand.u32 65535, %v2096_v7  ;;  %v340_v16 = vshrl.u32 %v2096_v7, 16 }
  0x12   : > { %vm558_vm10 = vcmask 1043456   ;;  %vm581_vm11 = vcmask 1042432   ;;  %vm604_vm14 = vcmask 1041408  }
  0x13   : > { %v397_v9 = vand.u32 65535, %v2099_v8  ;;  %v398_v10 = vshrl.u32 %v2099_v8, 16  ;;  %v342_v20 = vmul.u32 43691, %v339_v15  ;;  %v343_v21 = vmul.u32 43690, %v339_v15 }
  0x14   : > { %v344_v22 = vmul.u32 43691, %v340_v16  ;;  %v368_v23 = vand.u32 65535, %v2104_v11  ;;  %v369_v26 = vshrl.u32 %v2104_v11, 16  ;;  %v345_v28 = vmul.u32 43690, %v340_v16 }
  0x15   : > { %v400_v12 = vmul.u32 43691, %v397_v9  ;;  %v401_v13 = vmul.u32 43690, %v397_v9  ;;  %v402_v14 = vmul.u32 43691, %v398_v10  ;;  %v403_v17 = vmul.u32 43690, %v398_v10 }
  0x16   : > { %v346_v29 = vshll.u32 %v343_v21, 16  ;;  %v348_v30 = vshll.u32 %v344_v22, 16  ;;  %v2115_v33 = vmul.u32 43690, %v368_v23  ;;  %v371_v36 = vmul.u32 43691, %v368_v23 }
  0x17   : > { %v404_v18 = vshll.u32 %v401_v13, 16  ;;  %v406_v19 = vshll.u32 %v402_v14, 16  ;;  %v405_v24 = vshrl.u32 %v401_v13, 16  ;;  %v407_v31 = vshrl.u32 %v402_v14, 16 }
  0x18   : > { %vm350_vm3 = vc.u32 %v342_v20, %v346_v29  ;;  %v352_v35 = vadd.s32 %v346_v29, %v342_v20  ;;  %v2119_v39 = vmul.u32 43691, %v369_v26  ;;  %v375_v40 = vshll.u32 %v2115_v33, 16 }
  0x19   : > { %477 = vperm.xlu1 %2002, %v450_v4   ;;  %460 = vperm.xlu0 %2001, %v448_v5   ;;  %vm408_vm1 = vc.u32 %v400_v12, %v404_v18  ;;  %v410_v25 = vadd.s32 %v404_v18, %v400_v12  ;;  %v351_v38 = vsel %vm350_vm3, 1, %v2019_v1  ;;  %v347_v43 = vshrl.u32 %v343_v21, 16 }
  0x1a   : > { %v409_v27 = vsel %vm408_vm1, 1, %v2019_v1  ;;  %v353_v41 = vadd.s32 %v351_v38, %v345_v28  ;;  %vm354_vm4 = vc.u32 %v352_v35, %v348_v30  ;;  %v377_v47 = vshll.u32 %v2119_v39, 16 }
  0x1b   : > { %v411_v32 = vadd.s32 %v409_v27, %v403_v17  ;;  %vm412_vm2 = vc.u32 %v410_v25, %v406_v19  ;;  %v355_v44 = vsel %vm354_vm4, 1, %v2019_v1  ;;  %vm379_vm5 = vc.u32 %v371_v36, %v375_v40 }
  0x1c   : > { %v413_v34 = vsel %vm412_vm2, 1, %v2019_v1  ;;  %v357_v45 = vadd.s32 %v355_v44, %v353_v41  ;;  %v381_v48 = vadd.s32 %v375_v40, %v371_v36  ;;  %v349_v50 = vshrl.u32 %v344_v22, 16 }
  0x1d   : > { %v415_v37 = vadd.s32 %v413_v34, %v411_v32  ;;  %v374_v52 = vmul.u32 43690, %v369_v26  ;;  %v380_v54 = vsel %vm379_vm5, 1, %v2019_v1  ;;  %v2175_v14 = vperm.slane %v451_v49, 0 }
  0x1e   : > { %v358_v51 = vadd.s32 %v357_v45, %v347_v43  ;;  %vm383_vm6 = vc.u32 %v381_v48, %v377_v47  ;;  %v376_v17 = vshrl.u32 %v2115_v33, 16  ;;  %v378_v18 = vshrl.u32 %v2119_v39, 16 }
  0x1f   : > { %v416_v42 = vadd.s32 %v415_v37, %v405_v24  ;;  %v382_v0 = vadd.s32 %v380_v54, %v374_v52  ;;  %v384_v5 = vsel %vm383_vm6, 1, %v2019_v1  ;;  %vm627_vm1 = vcmask 1040384  }
  0x20   : > { %v2144_v63 = vadd.s32 %v358_v51, %v349_v50 }
  0x21   : > { %v417_v46 = vadd.s32 %v416_v42, %v407_v31  ;;  %v386_v19 = vadd.s32 %v384_v5, %v382_v0 }
  0x22   : > { %v360_v16 = vshrl.u32 %v2144_v63, 4 }
  0x23   : > { %v418_v53 = vshrl.u32 %v417_v46, 4 }
  0x25   : > { %v419_v4 = vmul.u32 24, %v418_v53 }
  0x27   : > { %v420_v23 = vsub.s32 %v2099_v8, %v419_v4 }
  0x29   : > { %vm425_vm12 = vcmp.ne.s32.totalorder %v420_v23, 0  ;;  %vm428_vm13 = vcmp.lt.s32.totalorder %v420_v23, 0  ;;  %v434_v44 = vadd.s32 24, %v420_v23 }
  0x2a   : > { %vm431_vm15 = vmand %vm428_vm13, %vm425_vm12 }
  0x83   : > { %v2138_v60 = vpop.permute.xlu1 %465  ;;  %v456_v15 = vpop.permute.xlu0 %455 }
  0x84   : > { %v2148_v2 = vmul.f32 %v2128_v55, %v2138_v60  ;;  %v2152_v3 = vmul.f32 %v2130_v56, %v2138_v60  ;;  %v2157_v6 = vmul.f32 %v2132_v57, %v2138_v60  ;;  %v2161_v9 = vmul.f32 %v2134_v58, %v2138_v60 }
  0x85   : > { %v2165_v10 = vmul.f32 %v2136_v59, %v2138_v60  ;;  %v2169_v12 = vmul.f32 %v2140_v61, %v2138_v60  ;;  %v2173_v13 = vmul.f32 %v2142_v62, %v2138_v60  ;;  %v471_v22 = vmul.f32 %v2175_v14, %v2138_v60 }
  0x86   : > { %v493_v20 = vrot.slane %v2148_v2, 1  ;;  %v516_v21 = vrot.slane %v2152_v3, 2  ;;  %v539_v24 = vrot.slane %v2157_v6, 3  ;;  %v562_v25 = vrot.slane %v2161_v9, 4 }
  0x87   : > { %v585_v26 = vrot.slane %v2165_v10, 5  ;;  %v608_v27 = vrot.slane %v2169_v12, 6  ;;  %v631_v28 = vrot.slane %v2173_v13, 7  ;;  %v2191_v29 = vmul.f32 %v2175_v14, %v456_v15 }
  0x88   : > { %v481_v30 = vmul.f32 %v2128_v55, %v456_v15  ;;  %v2195_v31 = vmul.f32 %v2130_v56, %v456_v15  ;;  %v2200_v32 = vmul.f32 %v2132_v57, %v456_v15  ;;  %v2203_v33 = vmul.f32 %v2134_v58, %v456_v15 }
  0x89   : > { %v2206_v34 = vmul.f32 %v2136_v59, %v456_v15  ;;  %v2215_v38 = vmul.f32 %v2140_v61, %v456_v15  ;;  %v2222_v43 = vmul.f32 %v2142_v62, %v456_v15 }
  0x8a   : > { %v490_v42 = vrot.slane %v481_v30, 1  ;;  %v513_v46 = vrot.slane %v2195_v31, 2  ;;  %v536_v50 = vrot.slane %v2200_v32, 3  ;;  %v559_v51 = vrot.slane %v2203_v33, 4 }
  0x8b   : > { %v2197_v8 = vpop.permute.xlu1 %477  ;;  %v2234_v54 = vpop.permute.xlu0 %460  ;;  %v582_v0 = vrot.slane %v2206_v34, 5  ;;  %v605_v30 = vrot.slane %v2215_v38, 6  ;;  %v2241_v31 = vsel %vm431_vm15, %v434_v44, %v420_v23  ;;  %v387_v33 = vadd.s32 %v386_v19, %v376_v17 }
  0x8c   : > { %v484_v35 = vmul.f32 %v2128_v55, %v2197_v8  ;;  %v507_v36 = vmul.f32 %v2130_v56, %v2197_v8  ;;  %v530_v37 = vmul.f32 %v2132_v57, %v2197_v8  ;;  %v553_v40 = vmul.f32 %v2134_v58, %v2197_v8 }
  0x8d   : > { %v576_v41 = vmul.f32 %v2136_v59, %v2197_v8  ;;  %v599_v49 = vmul.f32 %v2140_v61, %v2197_v8  ;;  %v622_v53 = vmul.f32 %v2142_v62, %v2197_v8  ;;  %v528_v23 = vmul.f32 %v2132_v57, %v2234_v54 }
  0x8e   : > { %v495_v39 = vrot.slane %v484_v35, 1  ;;  %v518_v45 = vrot.slane %v507_v36, 2  ;;  %v541_v48 = vrot.slane %v530_v37, 3  ;;  %v564_v5 = vrot.slane %v553_v40, 4 }
  0x8f   : > { %v587_v15 = vrot.slane %v576_v41, 5  ;;  %v610_v35 = vrot.slane %v599_v49, 6  ;;  %v482_v36 = vmul.f32 %v2128_v55, %v2234_v54  ;;  %v505_v37 = vmul.f32 %v2130_v56, %v2234_v54 }
  0x90   : > { %v496_v47 = vsel %vm489_vm7, %v493_v20, %v495_v39  ;;  %v519_v4 = vsel %vm512_vm8, %v516_v21, %v518_v45  ;;  %v633_v40 = vrot.slane %v622_v53, 7  ;;  %v388_v41 = vadd.s32 %v387_v33, %v378_v18 }
  0x91   : > { %v502_v52 = vadd.f32 %v496_v47, %v471_v22  ;;  %v542_v22 = vsel %vm535_vm9, %v539_v24, %v541_v48  ;;  %v565_v17 = vsel %vm558_vm10, %v562_v25, %v564_v5  ;;  %v588_v19 = vsel %vm581_vm11, %v585_v26, %v587_v15 }
  0x92   : > { %v361_v55 = vmul.u32 24, %v360_v16  ;;  %v491_v44 = vrot.slane %v482_v36, 1  ;;  %v389_v56 = vshrl.u32 %v388_v41, 4  ;;  %v470_v18 = vmul.f32 %v2175_v14, %v2234_v54  ;;  %v2274_v16 = vld [vmem:[%s2691_s1 + $0x8] ss:$0 sm:$0xff] }
  0x93   : > { %v525_v32 = vadd.f32 %v519_v4, %v502_v52  ;;  %v514_v47 = vrot.slane %v505_v37, 2  ;;  %vm440_vm2 = vcmp.ge.s32.totalorder %v2241_v31, 4  ;;  %v551_v49 = vmul.f32 %v2134_v58, %v2234_v54 }
  0x94   : > { %v492_v57 = vsel %vm489_vm7, %v490_v42, %v491_v44  ;;  %v494_v48 = vsel %vm489_vm7, %v491_v44, %v493_v20  ;;  %v574_v63 = vmul.f32 %v2136_v59, %v2234_v54  ;;  %v537_v42 = vrot.slane %v528_v23, 3 }
  0x95   : > { %v548_v39 = vadd.f32 %v542_v22, %v525_v32  ;;  %v500_v52 = vadd.f32 %v492_v57, %v2191_v29  ;;  %v501_v53 = vadd.f32 %v494_v48, %v470_v18  ;;  %vm443_vm3 = vcmp.lt.s32.totalorder %v2241_v31, 20 }
  0x96   : > { %v611_v2 = vsel %vm604_vm14, %v608_v27, %v610_v35  ;;  %v362_v58 = vsub.s32 %v2096_v7, %v361_v55  ;;  %v390_v20 = vmul.u32 24, %v389_v56  ;;  %v634_v4 = vsel %vm627_vm1, %v631_v28, %v633_v40  ;;  %v2004_v7 = vld [vmem:[%s2692_s2] ss:$0 sm:$0xff] }
  0x97   : > { %v571_v45 = vadd.f32 %v565_v17, %v548_v39  ;;  %v515_v5 = vsel %vm512_vm8, %v513_v46, %v514_v47  ;;  %v517_v29 = vsel %vm512_vm8, %v514_v47, %v516_v21  ;;  %v560_v33 = vrot.slane %v551_v49, 4 }
  0x98   : > { %v523_v15 = vadd.f32 %v515_v5, %v500_v52  ;;  %v524_v32 = vadd.f32 %v517_v29, %v501_v53  ;;  %v583_v22 = vrot.slane %v574_v63, 5  ;;  %v644_v36 = vmul.f32 %v2274_v16, %v2197_v8  ;;  %v1926_v8 = vld [vmem:[%s2693_s3 + $0x40] sm:$0xff]  ;;  %v693_v29 = vld [vmem:[#allocation2 + $0x14] sm:$0x3] }
  0x99   : > { %v594_v14 = vadd.f32 %v588_v19, %v571_v45  ;;  %v538_v37 = vsel %vm535_vm9, %v536_v50, %v537_v42  ;;  %v540_v3 = vsel %vm535_vm9, %v537_v42, %v539_v24  ;;  %v391_v21 = vsub.s32 %v2104_v11, %v390_v20  ;;  %990 = vmatpush.bf16.msra.mxu1 %v1926_v8 }
  0x9a   : > { %vm423_vm4 = vcmp.ne.s32.totalorder %v362_v58, 0  ;;  %v546_v46 = vadd.f32 %v538_v37, %v523_v15  ;;  %v547_v39 = vadd.f32 %v540_v3, %v524_v32  ;;  %vm426_vm5 = vcmp.lt.s32.totalorder %v362_v58, 0  ;;  %v689_v3 = vld [vmem:[#allocation2 + $0x4] sm:$0x8] }
  0x9b   : > { %v617_v59 = vadd.f32 %v611_v2, %v594_v14  ;;  %v561_v41 = vsel %vm558_vm10, %v559_v51, %v560_v33  ;;  %v563_v23 = vsel %vm558_vm10, %v560_v33, %v562_v25  ;;  %v432_v6 = vadd.s32 24, %v362_v58  ;;  %vm2320_vm10 = vmand %vm440_vm2, %vm443_vm3  ;;  %v691_v33 = vld [vmem:[#allocation2 + $0x14] sm:$0x1] }
  0x9c   : > { %v569_v50 = vadd.f32 %v561_v41, %v546_v46  ;;  %v570_v24 = vadd.f32 %v563_v23, %v547_v39  ;;  %v584_v11 = vsel %vm581_vm11, %v582_v0, %v583_v22  ;;  %v586_v51 = vsel %vm581_vm11, %v583_v22, %v585_v26  ;;  %vm429_vm12 = vmand %vm426_vm5, %vm423_vm4 }
  0x9d   : > { %v640_v35 = vadd.f32 %v634_v4, %v617_v59  ;;  %v597_v9 = vmul.f32 %v2140_v61, %v2234_v54  ;;  %v620_v25 = vmul.f32 %v2142_v62, %v2234_v54  ;;  %vm424_vm6 = vcmp.ne.s32.totalorder %v391_v21, 0 }
  0x9e   : > { %vm427_vm9 = vcmp.lt.s32.totalorder %v391_v21, 0  ;;  %v592_v19 = vadd.f32 %v584_v11, %v569_v50  ;;  %v593_v55 = vadd.f32 %v586_v51, %v570_v24  ;;  %v433_v62 = vadd.s32 24, %v391_v21 }
  0x9f   : > { %v647_v40 = vadd.f32 %v644_v36, %v640_v35  ;;  %v606_v26 = vrot.slane %v597_v9, 6  ;;  %v629_v61 = vrot.slane %v620_v25, 7  ;;  %v628_v0 = vrot.slane %v2222_v43, 7  ;;  %vm430_vm13 = vmand %vm427_vm9, %vm424_vm6 }
  0xa0   : > { %v643_v56 = vmul.f32 %v2274_v16, %v2138_v60  ;;  %v435_v43 = vsel %vm429_vm12, %v432_v6, %v362_v58  ;;  %v811_v32 = vunpack.c.l.b16 %v693_v29  ;;  %v775_v35 = vunpack.c.l.b16 %v691_v33 }
  0xa1   : > { %v654_v17 = vadd.f32 %v2004_v7, %v647_v40  ;;  %v607_v31 = vsel %vm604_vm14, %v605_v30, %v606_v26  ;;  %v609_v45 = vsel %vm604_vm14, %v606_v26, %v608_v27  ;;  %v630_v49 = vsel %vm627_vm1, %v628_v0, %v629_v61 }
  0xa2   : > { %v615_v47 = vadd.f32 %v607_v31, %v592_v19  ;;  %v616_v57 = vadd.f32 %v609_v45, %v593_v55  ;;  %v632_v38 = vsel %vm627_vm1, %v629_v61, %v631_v28  ;;  %v436_v30 = vsel %vm430_vm13, %v433_v62, %v391_v21  ;;  %v684_v45 = vld [vmem:[#allocation2 + $0x4] sm:$0xc]  ;;  %v1631_v28 = vld [vmem:[#allocation4] sm:$0x1] }
  0xa3   : > { %vm657_vm11 = vcmp.ge.f32.partialorder %v654_v17, 0.0  ;;  %v660_v10 = vmul.f32 0.01, %v654_v17  ;;  %v642_v27 = vmul.f32 %v2274_v16, %v2234_v54  ;;  %vm438_vm15 = vcmp.ge.s32.totalorder %v435_v43, 4 }
  0xa4   : > { %v638_v12 = vadd.f32 %v630_v49, %v615_v47  ;;  %v639_v63 = vadd.f32 %v632_v38, %v616_v57  ;;  %vm441_vm2 = vcmp.lt.s32.totalorder %v435_v43, 20  ;;  %vm439_vm3 = vcmp.ge.s32.totalorder %v436_v30, 4 }
  0xa5   : > { %v663_v44 = vsel %vm657_vm11, %v654_v17, %v660_v10  ;;  %vm442_vm4 = vcmp.lt.s32.totalorder %v436_v30, 20  ;;  %vm2344_vm5 = vmand %vm438_vm15, %vm441_vm2  ;;  %v729_v11 = vunpack.c.l.b16 %v689_v3  ;;  %v699_v57 = vunpack.c.l.b16 %v684_v45 }
  0xa6   : > { %v672_v18 = vsel %vm2320_vm10, %v663_v44, 0.0  ;;  %v645_v60 = vadd.f32 %v642_v27, %v638_v12  ;;  %v646_v14 = vadd.f32 %v643_v56, %v639_v63  ;;  %vm2348_vm6 = vmand %vm439_vm3, %vm442_vm4  ;;  %vm2701_vm12 = vsmask.f32 1280 }
  0xa7   : > { %v680_v48 = vpack.c.bf16 %v672_v18, %v672_v18  ;;  %vm708_vm13 = vsmask.f32 7424  ;;  %vm742_vm15 = vsmask.f32 6400  ;;  %vm2700_vm2 = vsmask.f32 256 }
  0xa8   : > { %v652_v52 = vadd.f32 %v2004_v7, %v645_v60  ;;  %v653_v53 = vadd.f32 %v2004_v7, %v646_v14  ;;  %vm842_vm3 = vcmask 261120   ;;  %vm847_vm4 = vcmask 392192  }
  0xa9   : > { %683 = vst.msk [vmem:[#allocation2 + $0x10] sm:$0xf] %vm673_vm0, %v680_v48 }
  0xaa   : > { %vm655_vm9 = vcmp.ge.f32.partialorder %v652_v52, 0.0  ;;  %vm656_vm11 = vcmp.ge.f32.partialorder %v653_v53, 0.0  ;;  %v658_v54 = vmul.f32 0.01, %v652_v52  ;;  %v659_v16 = vmul.f32 0.01, %v653_v53 }
  0xac   : > { %v661_v42 = vsel %vm655_vm9, %v652_v52, %v658_v54  ;;  %v662_v2 = vsel %vm656_vm11, %v653_v53, %v659_v16  ;;  %vm852_vm9 = vcmask 523264   ;;  %vm857_vm11 = vcmask 654336  }
  0xad   : > { %v670_v58 = vsel %vm2344_vm5, %v661_v42, 0.0  ;;  %v671_v20 = vsel %vm2348_vm6, %v662_v2, 0.0 }
  0xae   : > { %v678_v59 = vpack.c.bf16 %v670_v58, %v670_v58  ;;  %v679_v4 = vpack.c.bf16 %v671_v20, %v671_v20 }
  0xb0   : > { %v690_v5 = vld [vmem:[#allocation2 + $0x10] sm:$0xf]  ;;  %681 = vst.msk [vmem:[#allocation2 + $0x8] sm:$0xf] %vm673_vm0, %v678_v59 }
  0xb1   : > { %682 = vst.msk [vmem:[#allocation2 + $0xc] sm:$0xf] %vm673_vm0, %v679_v4  ;;  %v740_v15 = vunpack.c.l.b16 %v690_v5  ;;  %v688_v22 = vld [vmem:[#allocation2 + $0x10] sm:$0x7]  ;;  %vm836_vm0 = vcmask 130048  }
  0xb2   : > { %v706_v40 = vunpack.c.l.b16 %v688_v22 }
  0xb3   : > { %v2358_v7 = vpack.c.b16 %v811_v32, %v740_v15  ;;  %v2363_v17 = vpack.c.b16 %v775_v35, %v740_v15  ;;  %v765_v62 = vpack.c.b16 %v740_v15, %v740_v15 }
  0xb5   : > { %v901_v50 = vrot.slane %v2358_v7, 2  ;;  %v787_v44 = vshrl.u32 %v2363_v17, 16  ;;  %v790_v31 = vshll.u32 %v2363_v17, 16  ;;  %v768_v48 = vrot.slane %v765_v62, 6  ;;  %v1918_v62 = vld [vmem:[%s2693_s3] sm:$0xff] }
  0xb6   : > { %v804_v22 = vrot.slane %v2363_v17, 7  ;;  %v1925_v17 = vld [vmem:[%s2693_s3 + $0x38] sm:$0xff] }
  0xb7   : > { %v692_v36 = vld [vmem:[#allocation2 + $0x8] sm:$0xe]  ;;  %v789_v49 = vrot.slane %v787_v44, 6  ;;  %v792_v38 = vrot.slane %v790_v31, 7  ;;  %965 = vmatpush.bf16.msra.mxu0 %v1925_v17 }
  0xb8   : > { %v694_v37 = vld [vmem:[#allocation2 + $0x8] sm:$0xc]  ;;  %v800_v46 = vunpack.c.l.b16 %v692_v36 }
  0xb9   : > { %v1971_v21 = vld [vmem:[#allocation2 + $0x8] sm:$0xff]   ;;  %v834_v39 = vunpack.c.l.b16 %v694_v37  ;;  %v793_v14 = vor.u32 %v792_v38, %v789_v49 }
  0xba   : > { %v767_v41 = vrot.slane %v1971_v21, 6  ;;  %v2360_v23 = vunpack.c.h.b16 %v1971_v21  ;;  %v779_v8 = vshrl.u32 %v1971_v21, 16  ;;  %v782_v6 = vshll.u32 %v1971_v21, 16 }
  0xbb   : > { %v1965_v24 = vunpack.c.l.b16 %v1971_v21 }
  0xbc   : > { %770 = vrot.lane.b32.xlu1 %v767_v41, %s2020_s24  ;;  %v781_v51 = vrot.slane %v779_v8, 6  ;;  %v784_v9 = vrot.slane %v782_v6, 7  ;;  %v2367_v25 = vpack.c.b16 %v2360_v23, %v800_v46  ;;  %v835_v19 = vpack.c.b16 %v2360_v23, %v834_v39 }
  0xbd   : > { %v707_v61 = vpack.c.b16 %v706_v40, %v2360_v23  ;;  %v730_v0 = vpack.c.b16 %v1965_v24, %v729_v11  ;;  %v741_v47 = vpack.c.b16 %v740_v15, %v2360_v23  ;;  %v769_v27 = vsel %vm604_vm14, %v767_v41, %v768_v48 }
  0xbe   : > { %v785_v55 = vor.u32 %v784_v9, %v781_v51  ;;  %v803_v10 = vrot.slane %v2367_v25, 7  ;;  %v900_v26 = vrot.slane %v835_v19, 2  ;;  %v2381_v52 = vpack.c.b16 %v1965_v24, %v699_v57  ;;  %v1924_v51 = vld [vmem:[%s2693_s3 + $0x30] sm:$0xff]  ;;  %v1923_v9 = vld [vmem:[%s2693_s3 + $0x28] sm:$0xff]  ;;  %v1921_v19 = vld [vmem:[%s2693_s3 + $0x18] sm:$0xff] }
  0xbf   : > { %v733_v18 = vrot.slane %v707_v61, 1  ;;  %v732_v43 = vrot.slane %v730_v0, 1  ;;  %v717_v30 = vshll.u32 %v707_v61, 16  ;;  %v752_v12 = vshrl.u32 %v741_v47, 16  ;;  %966 = vmatpush.bf16.msra.mxu0 %v1924_v51 }
  0xc0   : > { %795 = vrot.lane.b32.xlu0 %v785_v55, %s2021_s25  ;;  %806 = vrot.lane.b32.xlu2 %v803_v10, %s2022_s26  ;;  %v902_v56 = vsel %vm512_vm8, %v900_v26, %v901_v50  ;;  %v755_v63 = vshll.u32 %v741_v47, 16  ;;  %v815_v42 = vshrl.u32 %v2367_v25, 16  ;;  %v794_v2 = vsel %vm2701_vm12, %v785_v55, %v793_v14  ;;  %v1919_v26 = vld [vmem:[%s2693_s3 + $0x8] sm:$0xff] }
  0xc1   : > { %1766 = vmatmul.msk.bf16.vlgmr.msra.gmra.mxu1 %vm836_vm0, %v902_v56  ;;  %v734_v60 = vsel %vm489_vm7, %v732_v43, %v733_v18  ;;  %v719_v53 = vrot.slane %v717_v30, 1  ;;  %v754_v54 = vrot.slane %v752_v12, 1  ;;  %v712_v58 = vshll.u32 %v2381_v52, 16  ;;  %v687_v56 = vld [vmem:[#allocation2 + $0x10] sm:$0x3] }
  0xc2   : > { %v757_v16 = vrot.slane %v755_v63, 2  ;;  %v721_v20 = vshrl.u32 %v707_v61, 16  ;;  %v817_v5 = vrot.slane %v815_v42, 7  ;;  %v818_v15 = vshll.u32 %v2367_v25, 16  ;;  %v1922_v25 = vld [vmem:[%s2693_s3 + $0x20] sm:$0xff] }
  0xc3   : > { %v714_v29 = vrot.slane %v712_v58, 1  ;;  %v710_v32 = vshrl.u32 %v2381_v52, 16  ;;  %v744_v36 = vshrl.u32 %v730_v0, 16  ;;  %v747_v37 = vshll.u32 %v730_v0, 16  ;;  %967 = vmatpush.bf16.msra.mxu0 %v1923_v9 }
  0xc4   : > { %737 = vrot.lane.b32.xlu1 %v733_v18, %s2023_s27  ;;  %v723_v59 = vor.u32 %v721_v20, %v719_v53  ;;  %v758_v4 = vor.u32 %v757_v16, %v754_v54  ;;  %v820_v33 = vor.u32 %v818_v15, %v817_v5  ;;  %v805_v3 = vsel %vm627_vm1, %v803_v10, %v804_v22  ;;  %v1920_v10 = vld [vmem:[%s2693_s3 + $0x10] sm:$0xff] }
  0xc5   : > { %v715_v35 = vor.u32 %v714_v29, %v710_v32  ;;  %v746_v46 = vrot.slane %v744_v36, 1  ;;  %v749_v39 = vrot.slane %v747_v37, 2  ;;  %v822_v41 = vshrl.u32 %v2358_v7, 16 }
  0xc6   : > { %v702_v47 = vunpack.c.l.b16 %v687_v56  ;;  %vm867_vm12 = vcmask 916480   ;;  %v1934_v56 = vld [vmem:[%s2695_s5 + $0x38] sm:$0xff] }
  0xc7   : > { %v720_v21 = vsel %vm708_vm13, %v715_v35, %v719_v53  ;;  %v750_v40 = vor.u32 %v749_v39, %v746_v46  ;;  %v824_v6 = vrot.slane %v822_v41, 7  ;;  %968 = vmatpush.bf16.msra.mxu0 %v1922_v25  ;;  %v2005_v35 = vld [vmem:[%s2694_s4] ss:$0 sm:$0xff]  ;;  %1509 = vmatpush.bf16.msra.mxu2 %v1934_v56 }
  0xc8   : > { %772 = vrot.lane.b32.xlu2 %v769_v27, %s2020_s24  ;;  %735 = vrot.lane.b32.xlu0 %v734_v60, %s2023_s27  ;;  %v704_v30 = vpack.c.b16 %v702_v47, %v2360_v23 }
  0xc9   : > { %v759_v8 = vsel %vm742_vm15, %v750_v40, %v758_v4 }
  0xcb   : > { %969 = vmatpush.bf16.msra.mxu0 %v1921_v19 }
  0xcc   : > { %797 = vrot.lane.b32.xlu1 %v794_v2, %s2021_s25 }
  0xcf   : > { %970 = vmatpush.bf16.msra.mxu0 %v1920_v10 }
  0xd0   : > { %726 = vrot.lane.b32.xlu2 %v723_v59, %s2024_s28  ;;  %762 = vrot.lane.b32.xlu0 %v758_v4, %s2025_s29 }
  0xd1   : > { %1767 = vmatmul.msk.bf16.gmra.mxu1 %vm836_vm0, %v901_v50  ;;  %v825_v50 = vshll.u32 %v2358_v7, 16 }
  0xd3   : > { %v827_v24 = vor.u32 %v825_v50, %v824_v6  ;;  %971 = vmatpush.bf16.msra.mxu0 %v1919_v26 }
  0xd4   : > { %829 = vrot.lane.b32.xlu1 %v820_v33, %s2026_s30 }
  0xd5   : > { %v828_v11 = vsel %vm2700_vm2, %v817_v5, %v827_v24  ;;  %vm862_vm2 = vcmask 785408  }
  0xd7   : > { %972 = vmatpush.bf16.msra.mxu0 %v1918_v62 }
  0xd8   : > { %808 = vrot.lane.b32.xlu0 %v805_v3, %s2022_s26  ;;  %724 = vrot.lane.b32.xlu2 %v720_v21, %s2024_s28 }
  0xe0   : > { %760 = vrot.lane.b32.xlu2 %v759_v8, %s2025_s29 }
  0xe8   : > { %831 = vrot.lane.b32.xlu2 %v828_v11, %s2026_s30 }
 0x11a   : > { %v807_v7 = vpop.permute.xlu2 %806 }
 0x122   : > { %v773_v55 = vpop.permute.xlu2 %772 }
 0x12a   : > { %v727_v61 = vpop.permute.xlu2 %726 }
 0x12b   : > { %v841_v63 = vsel %vm836_vm0, %v704_v30, %v727_v61 }
 0x12e   : > { %v771_v0 = vpop.permute.xlu1 %770 }
 0x132   : > { %v796_v44 = vpop.permute.xlu0 %795  ;;  %v725_v31 = vpop.permute.xlu2 %724 }
 0x133   : > { %v838_v57 = vsel %vm836_vm0, %v2381_v52, %v725_v31  ;;  %vm1013_vm0 = vcmask 519168  }
 0x134   : > { %1015 = vst.msk [vmem:[#allocation3 + $0x4] sm:$0xf] %vm1013_vm0, %v2019_v1 }
 0x135   : > { %1016 = vst.msk [vmem:[#allocation3 + $0x14] sm:$0xf] %vm1013_vm0, %v2019_v1 }
 0x136   : > { %v738_v45 = vpop.permute.xlu1 %737 }
 0x137   : > { %v846_v60 = vsel %vm842_vm3, %v841_v63, %v738_v45 }
 0x13a   : > { %v736_v18 = vpop.permute.xlu0 %735  ;;  %v761_v43 = vpop.permute.xlu2 %760 }
 0x13b   : > { %v844_v48 = vsel %vm842_vm3, %v838_v57, %v736_v18  ;;  %v1024_v25 = vld [vmem:[#allocation3 + $0x4] sm:$0xc] }
 0x13c   : > { %v849_v12 = vsel %vm847_vm4, %v844_v48, %v761_v43  ;;  %v1039_v62 = vunpack.c.l.b16 %v1024_v25  ;;  %v1031_v47 = vld [vmem:[#allocation3 + $0x14] sm:$0x1] }
 0x13d   : > { %v854_v14 = vsel %vm852_vm9, %v849_v12, %v771_v0  ;;  %v1033_v30 = vld [vmem:[#allocation3 + $0x14] sm:$0x3] }
 0x13e   : > { %v992_v49 = vpop.f32.mrf.mxu1  ;;  %v798_v38 = vpop.permute.xlu1 %797  ;;  %v859_v52 = vsel %vm857_vm11, %v854_v14, %v796_v44 }
 0x13f   : > { %v864_v2 = vsel %vm862_vm2, %v859_v52, %v807_v7 }
 0x142   : > { %v763_v27 = vpop.permute.xlu0 %762  ;;  %v832_v59 = vpop.permute.xlu2 %831 }
 0x143   : > { %v851_v53 = vsel %vm847_vm4, %v846_v60, %v763_v27 }
 0x144   : > { %v856_v16 = vsel %vm852_vm9, %v851_v53, %v773_v55  ;;  %v1029_v55 = vld [vmem:[#allocation3 + $0x4] sm:$0x8] }
 0x145   : > { %v861_v23 = vsel %vm857_vm11, %v856_v16, %v798_v38  ;;  %v1068_v44 = vunpack.c.l.b16 %v1029_v55  ;;  %v1103_v38 = vunpack.c.l.b16 %v1031_v47 }
 0x146   : > { %v994_v54 = vpop.f32.mrf.mxu1  ;;  %v830_v42 = vpop.permute.xlu1 %829 }
 0x147   : > { %v869_v58 = vsel %vm867_vm12, %v864_v2, %v830_v42 }
 0x148   : > { %v897_v29 = vrot.slane %v869_v58, 2  ;;  %v1133_v58 = vunpack.c.l.b16 %v1033_v30 }
 0x14a   : > { %v809_v20 = vpop.permute.xlu0 %808 }
 0x14b   : > { %v866_v4 = vsel %vm862_vm2, %v861_v23, %v809_v20 }
 0x14c   : > { %v871_v5 = vsel %vm867_vm12, %v866_v4, %v832_v59 }
 0x14d   : > { %v898_v15 = vrot.slane %v871_v5, 2 }
 0x14e   : > { %v997_v32 = vpop.f32.mrf.mxu1 }
 0x14f   : > { %v899_v33 = vsel %vm512_vm8, %v897_v29, %v898_v15 }
 0x150   : > { %973 = vmatmul.bf16.vlgmr.msra.gmra.mxu0 %v899_v33 }
 0x156   : > { %v999_v22 = vpop.f32.mrf.mxu1 }
 0x160   : > { %978 = vmatmul.bf16.gmra.mxu0 %v898_v15 }
 0x1cd   : > { %v974_v36 = vpop.f32.mrf.mxu0 }
 0x1ce   : > { %v975_v37 = vadd.f32 %v2005_v35, %v974_v36 }
 0x1d0   : > { %v993_v3 = vadd.f32 %v992_v49, %v975_v37 }
 0x1d2   : > { %vm1001_vm12 = vcmp.ge.f32.partialorder %v993_v3, 0.0  ;;  %v1004_v21 = vmul.f32 0.01, %v993_v3 }
 0x1d4   : > { %v1007_v46 = vsel %vm1001_vm12, %v993_v3, %v1004_v21 }
 0x1d5   : > { %v1010_v39 = vsel %vm2344_vm5, %v1007_v46, 0.0  ;;  %v976_v40 = vpop.f32.mrf.mxu0 }
 0x1d6   : > { %v1018_v41 = vpack.c.bf16 %v1010_v39, %v1010_v39  ;;  %v977_v8 = vadd.f32 %v2005_v35, %v976_v40 }
 0x1d8   : > { %1021 = vst.msk [vmem:[#allocation3 + $0x8] sm:$0xf] %vm1013_vm0, %v1018_v41  ;;  %v995_v6 = vadd.f32 %v994_v54, %v977_v8 }
 0x1da   : > { %vm1002_vm2 = vcmp.ge.f32.partialorder %v995_v6, 0.0  ;;  %v1005_v1 = vmul.f32 0.01, %v995_v6 }
 0x1dc   : > { %v1008_v50 = vsel %vm1002_vm2, %v995_v6, %v1005_v1 }
 0x1dd   : > { %v1011_v24 = vsel %vm2348_vm6, %v1008_v50, 0.0  ;;  %v979_v11 = vpop.f32.mrf.mxu0 }
 0x1de   : > { %v1019_v17 = vpack.c.bf16 %v1011_v24, %v1011_v24  ;;  %v980_v51 = vadd.f32 %v2005_v35, %v979_v11 }
 0x1df   : > { %v1032_v48 = vld [vmem:[#allocation3 + $0x8] sm:$0xe] }
 0x1e0   : > { %1022 = vst.msk [vmem:[#allocation3 + $0xc] sm:$0xf] %vm1013_vm0, %v1019_v17  ;;  %v998_v9 = vadd.f32 %v997_v32, %v980_v51  ;;  %v1034_v43 = vld [vmem:[#allocation3 + $0x8] sm:$0xc]  ;;  %v1127_v14 = vunpack.c.l.b16 %v1032_v48 }
 0x1e1   : > { %v1155_v53 = vunpack.c.l.b16 %v1034_v43 }
 0x1e2   : > { %vm1003_vm3 = vcmp.ge.f32.partialorder %v998_v9, 0.0  ;;  %v1006_v7 = vmul.f32 0.01, %v998_v9 }
 0x1e4   : > { %v1009_v19 = vsel %vm1003_vm3, %v998_v9, %v1006_v7 }
 0x1e5   : > { %v1012_v10 = vsel %vm2320_vm10, %v1009_v19, 0.0  ;;  %v981_v26 = vpop.f32.mrf.mxu0 }
 0x1e6   : > { %v1020_v61 = vpack.c.bf16 %v1012_v10, %v1012_v10 }
 0x1e7   : > { %v2445_v0 = vld [vmem:[#allocation3 + $0x8] sm:$0xff]  }
 0x1e8   : > { %1023 = vst.msk [vmem:[#allocation3 + $0x10] sm:$0xf] %vm1013_vm0, %v1020_v61  ;;  %v1969_v31 = vunpack.c.l.b16 %v2445_v0  ;;  %v2456_v49 = vunpack.c.h.b16 %v2445_v0  ;;  %v1106_v42 = vshrl.u32 %v2445_v0, 16  ;;  %v1109_v50 = vshll.u32 %v2445_v0, 16 }
 0x1e9   : > { %v1099_v24 = vrot.slane %v2445_v0, 6 }
 0x1ea   : > { %v2449_v45 = vpack.c.b16 %v1969_v31, %v1039_v62  ;;  %v1069_v18 = vpack.c.b16 %v1969_v31, %v1068_v44  ;;  %v2460_v2 = vpack.c.b16 %v2456_v49, %v1127_v14  ;;  %v1156_v23 = vpack.c.b16 %v2456_v49, %v1155_v53 }
 0x1eb   : > { %v1108_v56 = vrot.slane %v1106_v42, 6  ;;  %v1950_v42 = vld [vmem:[%s2695_s5 + $0xb8] sm:$0xff] }
 0x1ec   : > { %v1051_v57 = vshll.u32 %v2449_v45, 16  ;;  %v1077_v27 = vshrl.u32 %v1069_v18, 16  ;;  %v1080_v60 = vshll.u32 %v1069_v18, 16  ;;  %v1049_v59 = vshrl.u32 %v2449_v45, 16  ;;  %1545 = vmatpush.bf16.msrb.mxu1 %v1950_v42 }
 0x1ed   : > { %v1070_v32 = vrot.slane %v1069_v18, 1  ;;  %v1129_v19 = vrot.slane %v2460_v2, 7  ;;  %v1276_v10 = vrot.slane %v1156_v23, 2  ;;  %v1111_v18 = vrot.slane %v1109_v50, 7  ;;  %v1941_v23 = vld [vmem:[%s2695_s5 + $0x70] sm:$0xff]  ;;  %v1936_v50 = vld [vmem:[%s2695_s5 + $0x48] sm:$0xff] }
 0x1ee   : > { %v1053_v52 = vrot.slane %v1051_v57, 1  ;;  %v1079_v29 = vrot.slane %v1077_v27, 1  ;;  %v1082_v15 = vrot.slane %v1080_v60, 2  ;;  %v1136_v43 = vshrl.u32 %v2460_v2, 16 }
 0x1ef   : > { %v1028_v12 = vld [vmem:[#allocation3 + $0x10] sm:$0x7]  ;;  %v1139_v60 = vshll.u32 %v2460_v2, 16 }
 0x1f0   : > { %v1030_v63 = vld [vmem:[#allocation3 + $0x10] sm:$0xf]  ;;  %v1046_v54 = vunpack.c.l.b16 %v1028_v12  ;;  %v1054_v22 = vor.u32 %v1053_v52, %v1049_v59  ;;  %v1083_v1 = vor.u32 %v1082_v15, %v1079_v29  ;;  %v1933_v52 = vld [vmem:[%s2695_s5 + $0x30] sm:$0xff]  ;;  %v1931_v59 = vld [vmem:[%s2695_s5 + $0x20] sm:$0xff] }
 0x1f1   : > { %v1074_v16 = vunpack.c.l.b16 %v1030_v63  ;;  %v1138_v63 = vrot.slane %v1136_v43, 7  ;;  %1510 = vmatpush.bf16.msra.mxu2 %v1933_v52  ;;  %v1958_v29 = vld [vmem:[%s2695_s5 + $0xf8] sm:$0xff]  ;;  %v1959_v43 = vld [vmem:[%s2695_s5 + $0x100] sm:$0xff] }
 0x1f2   : > { %v2464_v20 = vpack.c.b16 %v1046_v54, %v2456_v49  ;;  %v1930_v15 = vld [vmem:[%s2695_s5 + $0x18] sm:$0xff]  ;;  %1563 = vmatpush.bf16.msrb.mxu0 %v1958_v29 }
 0x1f3   : > { %v1075_v4 = vpack.c.b16 %v1074_v16, %v2456_v49  ;;  %v1104_v5 = vpack.c.b16 %v1103_v38, %v1074_v16  ;;  %v1098_v33 = vpack.c.b16 %v1074_v16, %v1074_v16  ;;  %v2470_v39 = vpack.c.b16 %v1133_v58, %v1074_v16  ;;  %v1942_v16 = vld [vmem:[%s2695_s5 + $0x78] sm:$0xff]  ;;  %v1932_v58 = vld [vmem:[%s2695_s5 + $0x28] sm:$0xff] }
 0x1f4   : > { %v1056_v35 = vshll.u32 %v2464_v20, 16  ;;  %v1060_v3 = vshrl.u32 %v2464_v20, 16  ;;  %v1071_v6 = vrot.slane %v2464_v20, 1  ;;  %v1112_v38 = vor.u32 %v1111_v18, %v1108_v56  ;;  %1527 = vmatpush.bf16.msra.mxu3 %v1942_v16  ;;  %v1960_v56 = vld [vmem:[%s2695_s5 + $0x108] sm:$0xff] }
 0x1f5   : > { %v1085_v36 = vshrl.u32 %v1075_v4, 16  ;;  %v1088_v37 = vshll.u32 %v1075_v4, 16  ;;  %v1114_v21 = vshrl.u32 %v1104_v5, 16  ;;  %v1117_v46 = vshll.u32 %v1104_v5, 16  ;;  %1511 = vmatpush.bf16.msra.mxu2 %v1932_v58  ;;  %v1949_v4 = vld [vmem:[%s2695_s5 + $0xb0] sm:$0xff] }
 0x1f6   : > { %v1058_v40 = vrot.slane %v1056_v35, 1  ;;  %v1100_v11 = vrot.slane %v1098_v33, 6  ;;  %v2479_v7 = vsel %vm489_vm7, %v1070_v32, %v1071_v6  ;;  %v1130_v55 = vrot.slane %v1104_v5, 7  ;;  %v1940_v5 = vld [vmem:[%s2695_s5 + $0x68] sm:$0xff]  ;;  %1546 = vmatpush.bf16.msrb.mxu1 %v1949_v4  ;;  %v1939_v33 = vld [vmem:[%s2695_s5 + $0x60] sm:$0xff]  ;;  %v1929_v35 = vld [vmem:[%s2695_s5 + $0x10] sm:$0xff] }
 0x1f7   : > { %v1087_v41 = vrot.slane %v1085_v36, 1  ;;  %v1090_v8 = vrot.slane %v1088_v37, 2  ;;  %v1116_v61 = vrot.slane %v1114_v21, 6  ;;  %v1119_v62 = vrot.slane %v1117_v46, 7  ;;  %v1948_v32 = vld [vmem:[%s2695_s5 + $0xa8] sm:$0xff]  ;;  %v1947_v36 = vld [vmem:[%s2695_s5 + $0xa0] sm:$0xff] }
 0x1f8   : > { %v1059_v17 = vsel %vm708_vm13, %v1054_v22, %v1058_v40  ;;  %v1062_v51 = vor.u32 %v1060_v3, %v1058_v40  ;;  %v2485_v25 = vsel %vm604_vm14, %v1099_v24, %v1100_v11  ;;  %v1277_v44 = vrot.slane %v2470_v39, 2  ;;  %1528 = vmatpush.bf16.msra.mxu3 %v1941_v23  ;;  %v1957_v22 = vld [vmem:[%s2695_s5 + $0xf0] sm:$0xff]  ;;  %v1938_v37 = vld [vmem:[%s2695_s5 + $0x58] sm:$0xff]  ;;  %v1956_v3 = vld [vmem:[%s2695_s5 + $0xe8] sm:$0xff] }
 0x1f9   : > { %v1091_v9 = vor.u32 %v1090_v8, %v1087_v41  ;;  %1063 = vrot.lane.b32.xlu0 %v1059_v17, %s2020_s24  ;;  %v2495_v31 = vsel %vm627_vm1, %v1129_v19, %v1130_v55  ;;  %v1143_v57 = vshrl.u32 %v2470_v39, 16  ;;  %v1120_v48 = vor.u32 %v1119_v62, %v1116_v61  ;;  %1512 = vmatpush.bf16.msra.mxu2 %v1931_v59  ;;  %v1928_v21 = vld [vmem:[%s2695_s5 + $0x8] sm:$0xff]  ;;  %v1946_v46 = vld [vmem:[%s2695_s5 + $0x98] sm:$0xff]  ;;  %v1937_v40 = vld [vmem:[%s2695_s5 + $0x50] sm:$0xff] }
 0x1fa   : > { %1065 = vrot.lane.b32.xlu1 %v1062_v51, %s2020_s24  ;;  %v2500_v47 = vsel %vm512_vm8, %v1276_v10, %v1277_v44  ;;  %vm2708_vm7 = vsmask.f32 1280  ;;  %v1146_v27 = vshll.u32 %v2470_v39, 16  ;;  %v1141_v53 = vor.u32 %v1139_v60, %v1138_v63  ;;  %1547 = vmatpush.bf16.msrb.mxu1 %v1948_v32  ;;  %v1927_v41 = vld [vmem:[%s2695_s5] sm:$0xff]  ;;  %v1945_v8 = vld [vmem:[%s2695_s5 + $0x90] sm:$0xff]  ;;  %v1962_v11 = vld [vmem:[%s2695_s5 + $0x118] sm:$0xff] }
 0x1fb   : > { %v1092_v26 = vsel %vm742_vm15, %v1083_v1, %v1091_v9  ;;  %v1145_v30 = vrot.slane %v1143_v57, 7  ;;  %v1121_v12 = vsel %vm2708_vm7, %v1112_v38, %v1120_v48  ;;  %vm2709_vm14 = vsmask.f32 256  ;;  %1564 = vmatpush.bf16.msrb.mxu0 %v1957_v22  ;;  %v1955_v1 = vld [vmem:[%s2695_s5 + $0xe0] sm:$0xff]  ;;  %v1944_v17 = vld [vmem:[%s2695_s5 + $0x88] sm:$0xff]  ;;  %v1954_v51 = vld [vmem:[%s2695_s5 + $0xd8] sm:$0xff] }
 0x1fc   : > { %1093 = vrot.lane.b32.xlu2 %v1092_v26, %s2020_s24  ;;  %1529 = vmatpush.bf16.msra.mxu3 %v1940_v5  ;;  %v1943_v55 = vld [vmem:[%s2695_s5 + $0x80] sm:$0xff]  ;;  %v1953_v10 = vld [vmem:[%s2695_s5 + $0xd0] sm:$0xff]  ;;  %v1952_v61 = vld [vmem:[%s2695_s5 + $0xc8] sm:$0xff]  ;;  %vm1674_vm15 = vcmask 0  }
 0x1fd   : > { %v1148_v14 = vor.u32 %v1146_v27, %v1145_v30  ;;  %1513 = vmatpush.bf16.msra.mxu2 %v1930_v15  ;;  %v1961_v26 = vld [vmem:[%s2695_s5 + $0x110] sm:$0xff]  ;;  %v1951_v62 = vld [vmem:[%s2695_s5 + $0xc0] sm:$0xff]  ;;  %v1027_v18 = vld [vmem:[#allocation3 + $0x10] sm:$0x3] }
 0x1fe   : > { %1548 = vmatpush.bf16.msrb.mxu1 %v1947_v36  ;;  %v1042_v48 = vunpack.c.l.b16 %v1027_v18 }
 0x1ff   : > { %v1149_v54 = vsel %vm2709_vm14, %v1138_v63, %v1148_v14  ;;  %1565 = vmatpush.bf16.msrb.mxu0 %v1956_v3 }
 0x200   : > { %1530 = vmatpush.bf16.msra.mxu3 %v1939_v33  ;;  %v1044_v30 = vpack.c.b16 %v1042_v48, %v2456_v49 }
 0x201   : > { %1095 = vrot.lane.b32.xlu0 %v1091_v9, %s2020_s24  ;;  %1514 = vmatpush.bf16.msra.mxu2 %v1929_v35  ;;  %v1935_v9 = vld [vmem:[%s2695_s5 + $0x40] sm:$0xff] }
 0x202   : > { %1122 = vrot.lane.b32.xlu1 %v1112_v38, %s2020_s24  ;;  %1549 = vmatpush.bf16.msrb.mxu1 %v1946_v46 }
 0x203   : > { %1566 = vmatpush.bf16.msrb.mxu0 %v1955_v1 }
 0x204   : > { %1124 = vrot.lane.b32.xlu2 %v1121_v12, %s2020_s24  ;;  %1531 = vmatpush.bf16.msra.mxu3 %v1938_v37  ;;  %v2006_v37 = vld [vmem:[%s2696_s6] ss:$0 sm:$0xff] }
 0x205   : > { %1515 = vmatpush.bf16.msra.mxu2 %v1928_v21 }
 0x206   : > { %1550 = vmatpush.bf16.msrb.mxu1 %v1945_v8  ;;  %v1629_v8 = vld [vmem:[%s2697_s7 + $0x30] sm:$0xff] }
 0x207   : > { %1567 = vmatpush.bf16.msrb.mxu0 %v1954_v51 }
 0x208   : > { %1532 = vmatpush.bf16.msra.mxu3 %v1937_v40 }
 0x209   : > { %1150 = vrot.lane.b32.xlu0 %v1141_v53, %s2020_s24  ;;  %1516 = vmatpush.bf16.msra.mxu2 %v1927_v41 }
 0x20a   : > { %1152 = vrot.lane.b32.xlu1 %v1149_v54, %s2020_s24  ;;  %1551 = vmatpush.bf16.msrb.mxu1 %v1944_v17 }
 0x20b   : > { %1568 = vmatpush.bf16.msrb.mxu0 %v1953_v10 }
 0x20c   : > { %1533 = vmatpush.bf16.msra.mxu3 %v1936_v50  ;;  %v1628_v50 = vld [vmem:[%s2697_s7 + $0x28] sm:$0xff] }
 0x20d   : > { %1585 = vmatpush.bf16.msrb.mxu2 %v1962_v11 }
 0x20e   : > { %1552 = vmatpush.bf16.msrb.mxu1 %v1943_v55 }
 0x20f   : > { %1569 = vmatpush.bf16.msrb.mxu0 %v1952_v61 }
 0x210   : > { %1534 = vmatpush.bf16.msra.mxu3 %v1935_v9 }
 0x211   : > { %1586 = vmatpush.bf16.msrb.mxu2 %v1961_v26 }
 0x212   : > { %1973 = vmatpush.bf16.msra.mxu1 %v1958_v29 }
 0x213   : > { %1570 = vmatpush.bf16.msrb.mxu0 %v1951_v62 }
 0x214   : > { %1981 = vmatpush.bf16.msrb.mxu3 %v1962_v11 }
 0x215   : > { %1587 = vmatpush.bf16.msrb.mxu2 %v1960_v56 }
 0x216   : > { %1974 = vmatpush.bf16.msra.mxu1 %v1957_v22 }
 0x218   : > { %1982 = vmatpush.bf16.msrb.mxu3 %v1961_v26 }
 0x219   : > { %1588 = vmatpush.bf16.msrb.mxu2 %v1959_v43 }
 0x21a   : > { %1975 = vmatpush.bf16.msra.mxu1 %v1956_v3 }
 0x21c   : > { %1983 = vmatpush.bf16.msrb.mxu3 %v1960_v56 }
 0x21e   : > { %1976 = vmatpush.bf16.msra.mxu1 %v1955_v1 }
 0x220   : > { %1984 = vmatpush.bf16.msrb.mxu3 %v1959_v43 }
 0x222   : > { %1977 = vmatpush.bf16.msra.mxu1 %v1954_v51  ;;  %v1627_v51 = vld [vmem:[%s2697_s7 + $0x20] sm:$0xff] }
 0x226   : > { %1978 = vmatpush.bf16.msra.mxu1 %v1953_v10 }
 0x22a   : > { %1979 = vmatpush.bf16.msra.mxu1 %v1952_v61 }
 0x22e   : > { %1980 = vmatpush.bf16.msra.mxu1 %v1951_v62  ;;  %v1626_v62 = vld [vmem:[%s2697_s7 + $0x18] sm:$0xff] }
 0x256   : > { %v1094_v57 = vpop.permute.xlu2 %1093 }
 0x257   : > { %v1164_v52 = vsel %vm852_vm9, %v2479_v7, %v1094_v57  ;;  %v1625_v57 = vld [vmem:[%s2697_s7 + $0x10] sm:$0xff] }
 0x258   : > { %v1267_v58 = vrot.slane %v1164_v52, 2 }
 0x25e   : > { %v1125_v53 = vpop.permute.xlu2 %1124 }
 0x25f   : > { %v1173_v49 = vsel %vm852_vm9, %v2485_v25, %v1125_v53 }
 0x260   : > { %v1271_v4 = vrot.slane %v1173_v49, 2 }
 0x26b   : > { %v1064_v38 = vpop.permute.xlu0 %1063 }
 0x26c   : > { %v1158_v12 = vsel %vm852_vm9, %v2449_v45, %v1064_v38  ;;  %v1066_v63 = vpop.permute.xlu1 %1065 }
 0x26d   : > { %v1264_v27 = vrot.slane %v1158_v12, 2  ;;  %v1161_v60 = vsel %vm852_vm9, %v1044_v30, %v1066_v63  ;;  %v1624_v30 = vld [vmem:[%s2697_s7 + $0x8] sm:$0xff] }
 0x26e   : > { %v1265_v14 = vrot.slane %v1161_v60, 2 }
 0x270   : > { %v1266_v54 = vsel %vm512_vm8, %v1264_v27, %v1265_v14  ;;  %v1623_v27 = vld [vmem:[%s2697_s7] sm:$0xff] }
 0x271   : > { %1517 = vmatmul.bf16.vlgmr.msra.gmra.mxu2 %v1266_v54 }
 0x273   : > { %v1096_v16 = vpop.permute.xlu0 %1095 }
 0x274   : > { %v1167_v45 = vsel %vm852_vm9, %v1071_v6, %v1096_v16  ;;  %v1123_v42 = vpop.permute.xlu1 %1122 }
 0x275   : > { %v1268_v23 = vrot.slane %v1167_v45, 2  ;;  %v1170_v59 = vsel %vm852_vm9, %v1099_v24, %v1123_v42 }
 0x276   : > { %v1270_v5 = vrot.slane %v1170_v59, 2 }
 0x277   : > { %v1269_v7 = vsel %vm512_vm8, %v1267_v58, %v1268_v23 }
 0x278   : > { %1535 = vmatmul.bf16.vlgmr.msra.gmra.mxu3 %v1269_v7  ;;  %v1272_v25 = vsel %vm512_vm8, %v1270_v5, %v1271_v4 }
 0x279   : > { %1553 = vmatmul.bf16.vlgmr.msrb.gmra.mxu1 %v1272_v25 }
 0x27b   : > { %v1151_v29 = vpop.permute.xlu0 %1150 }
 0x27c   : > { %v1176_v20 = vsel %vm852_vm9, %v1129_v19, %v1151_v29  ;;  %v1153_v6 = vpop.permute.xlu1 %1152 }
 0x27d   : > { %v1273_v15 = vrot.slane %v1176_v20, 2  ;;  %v1179_v0 = vsel %vm852_vm9, %v2495_v31, %v1153_v6 }
 0x27e   : > { %v1274_v24 = vrot.slane %v1179_v0, 2 }
 0x280   : > { %v1275_v32 = vsel %vm512_vm8, %v1273_v15, %v1274_v24 }
 0x281   : > { %1522 = vmatmul.bf16.gmra.mxu2 %v1265_v14  ;;  %1571 = vmatmul.bf16.vlgmr.msrb.gmra.mxu0 %v1275_v32 }
 0x288   : > { %1540 = vmatmul.bf16.gmra.mxu3 %v1268_v23 }
 0x289   : > { %1558 = vmatmul.bf16.gmra.mxu1 %v1271_v4 }
 0x291   : > { %1912 = vmatmul.msk.bf16.vlgmr.msrb.gmra.mxu2 %vm852_vm9, %v2500_v47 }
 0x298   : > { %1913 = vmatmul.msk.bf16.vlgmr.msrb.gmra.mxu3 %vm852_vm9, %v1277_v44  ;;  %v1630_v44 = vld [vmem:[%s2697_s7 + $0x38] sm:$0xff] }
 0x299   : > { %1576 = vmatmul.bf16.vlgmr.msra.gmra.mxu1 %v1274_v24  ;;  %1643 = vmatpush.msra.mxu3 %v1630_v44 }
 0x29b   : > { %1644 = vmatpush.msra.mxu3 %v1629_v8 }
 0x29d   : > { %1645 = vmatpush.msra.mxu3 %v1628_v50 }
 0x29f   : > { %1646 = vmatpush.msra.mxu3 %v1627_v51 }
 0x2a1   : > { %1647 = vmatpush.msra.mxu3 %v1626_v62 }
 0x2a3   : > { %1648 = vmatpush.msra.mxu3 %v1625_v57 }
 0x2a5   : > { %1649 = vmatpush.msra.mxu3 %v1624_v30 }
 0x2a7   : > { %1650 = vmatpush.msra.mxu3 %v1623_v27 }
 0x2f4   : > { %v1518_v2 = vpop.f32.mrf.mxu2 }
 0x2f5   : > { %v1519_v21 = vadd.f32 %v2006_v37, %v1518_v2 }
 0x2f6   : > { %v1554_v19 = vpop.f32.mrf.mxu1 }
 0x2fb   : > { %v1536_v33 = vpop.f32.mrf.mxu3 }
 0x2fc   : > { %v1520_v22 = vpop.f32.mrf.mxu2  ;;  %v1537_v46 = vadd.f32 %v1536_v33, %v1519_v21 }
 0x2fd   : > { %v1521_v11 = vadd.f32 %v2006_v37, %v1520_v22 }
 0x2fe   : > { %v1556_v31 = vpop.f32.mrf.mxu1  ;;  %v1572_v39 = vpop.f32.mrf.mxu0  ;;  %v1555_v1 = vadd.f32 %v1554_v19, %v1537_v46 }
 0x300   : > { %v1573_v9 = vadd.f32 %v1572_v39, %v1555_v1 }
 0x303   : > { %v1538_v35 = vpop.f32.mrf.mxu3 }
 0x304   : > { %v1523_v36 = vpop.f32.mrf.mxu2  ;;  %v1539_v55 = vadd.f32 %v1538_v35, %v1521_v11 }
 0x305   : > { %v1524_v17 = vadd.f32 %v2006_v37, %v1523_v36 }
 0x306   : > { %v1559_v3 = vpop.f32.mrf.mxu1  ;;  %v1557_v48 = vadd.f32 %v1556_v31, %v1539_v55  ;;  %v1574_v43 = vpop.f32.mrf.mxu0 }
 0x308   : > { %v1575_v60 = vadd.f32 %v1574_v43, %v1557_v48 }
 0x30b   : > { %v1541_v47 = vpop.f32.mrf.mxu3 }
 0x30c   : > { %v1525_v40 = vpop.f32.mrf.mxu2  ;;  %v1542_v26 = vadd.f32 %v1541_v47, %v1524_v17 }
 0x30e   : > { %v1561_v41 = vpop.f32.mrf.mxu1  ;;  %v1560_v38 = vadd.f32 %v1559_v3, %v1542_v26 }
 0x313   : > { %v1543_v10 = vpop.f32.mrf.mxu3 }
 0x314   : > { %v1590_v61 = vpop.f32.mrf.mxu2 }
 0x315   : > { %v1591_v56 = vadd.f32 %v1590_v61, %v1573_v9 }
 0x316   : > { %v1577_v18 = vpop.f32.mrf.mxu1 }
 0x317   : > { %v1602_v12 = vmul.f32 0.01, %v1591_v56  ;;  %vm1599_vm8 = vcmp.ge.f32.partialorder %v1591_v56, 0.0  ;;  %v1578_v63 = vadd.f32 %v1577_v18, %v1560_v38 }
 0x319   : > { %v1605_v52 = vsel %vm1599_vm8, %v1591_v56, %v1602_v12 }
 0x31a   : > { %v1608_v58 = vsel %vm2344_vm5, %v1605_v52, 0.0 }
 0x31b   : > { %v1595_v14 = vpop.f32.mrf.mxu3  ;;  %v1611_v7 = vsel %vm852_vm9, %v1608_v58, 0.0 }
 0x31c   : > { %v1596_v53 = vadd.f32 %v1595_v14, %v1578_v63  ;;  %v1592_v54 = vpop.f32.mrf.mxu2 }
 0x31d   : > { %v1593_v49 = vadd.f32 %v1592_v54, %v1575_v60 }
 0x31e   : > { %vm1601_vm1 = vcmp.ge.f32.partialorder %v1596_v53, 0.0  ;;  %v1604_v16 = vmul.f32 0.01, %v1596_v53  ;;  %v1579_v45 = vpop.f32.mrf.mxu1 }
 0x31f   : > { %vm1600_vm13 = vcmp.ge.f32.partialorder %v1593_v49, 0.0  ;;  %v1603_v42 = vmul.f32 0.01, %v1593_v49 }
 0x320   : > { %v1607_v23 = vsel %vm1601_vm1, %v1596_v53, %v1604_v16 }
 0x321   : > { %v1606_v59 = vsel %vm1600_vm13, %v1593_v49, %v1603_v42  ;;  %v1610_v4 = vsel %vm2320_vm10, %v1607_v23, 0.0 }
 0x322   : > { %v1609_v5 = vsel %vm2348_vm6, %v1606_v59, 0.0  ;;  %v1614_v6 = vsel %vm852_vm9, %v1610_v4, 0.0 }
 0x323   : > { %v1612_v25 = vsel %vm852_vm9, %v1609_v5, 0.0  ;;  %v1597_v29 = vpop.f32.mrf.mxu3 }
 0x324   : > { %v1613_v20 = vadd.f32 %v1612_v25, %v1611_v7 }
 0x326   : > { %v1615_v15 = vadd.f32 %v1614_v6, %v1613_v20 }
 0x328   : > { %v1616_v0 = vrot.slane %v1615_v15, 4 }
 0x32a   : > { %v1617_v13 = vadd.f32 %v1616_v0, %v1615_v15 }
 0x32c   : > { %v1618_v24 = vrot.slane %v1617_v13, 2 }
 0x32e   : > { %v1619_v32 = vadd.f32 %v1618_v24, %v1617_v13 }
 0x330   : > { %v1620_v2 = vrot.slane %v1619_v32, 1 }
 0x332   : > { %v1621_v19 = vadd.f32 %v1620_v2, %v1619_v32 }
 0x334   : > { %v1622_v34 = vmul.f32 0.0625, %v1621_v19 }
 0x336   : > { %1914 = vmatmul.msk.f32.vlgmr.msra.gmra.mxu3 %vm852_vm9, %v1622_v34 }
 0x3b9   : > { %v1652_v33 = vpop.f32.mrf.mxu3 }
 0x3ba   : > { %v1653_v22 = vadd.f32 %v1652_v33, %v1631_v28 }
 0x3bc   : > { %v1655_v31 = vsub.f32 0.0, %v1653_v22 }
 0x3be   : > { %v1656_v35 = vmul.f32 1.442695, %v1655_v31 }
 0x3c0   : > { %2007 = vpow2.f32 %v1656_v35 }
 0x3c6   : > { %v2008_v36 = vpop.eup %2007 }
 0x3c7   : > { %v1658_v37 = vadd.f32 1.0, %v2008_v36 }
 0x3c9   : > { %2009 = vrcp.f32 %v1658_v37  ;;  %v1670_v47 = vand.u32 2147483648, %v1658_v37  ;;  %v1668_v39 = vand.u32 2147483647, %v1658_v37  ;;  %vm1664_vm5 = vweird.f32 %v1658_v37 }
 0x3cb   : > { %v1671_v44 = vor.u32 1.1754944e-38, %v1670_v47  ;;  %vm1669_vm4 = vcmp.eq.f32.partialorder %v1668_v39, 8.507059e+37 }
 0x3cf   : > { %v2010_v3 = vpop.eup %2009 }
 0x3d0   : > { %v1660_v21 = vmul.f32 %v2010_v3, %v1658_v37  ;;  %vm1665_vm10 = vweird.f32 %v2010_v3 }
 0x3d1   : > { %vm1666_vm6 = vmor %vm1664_vm5, %vm1665_vm10 }
 0x3d2   : > { %v1661_v46 = vsub.f32 1.0, %v1660_v21 }
 0x3d4   : > { %v1662_v40 = vmul.f32 %v2010_v3, %v1661_v46 }
 0x3d6   : > { %v1663_v41 = vadd.f32 %v2010_v3, %v1662_v40 }
 0x3d8   : > { %v1667_v8 = vsel %vm1666_vm6, %v2010_v3, %v1663_v41 }
 0x3d9   : > { %v1672_v1 = vsel %vm1669_vm4, %v1671_v44, %v1667_v8 }
 0x3da   : > { %1675 = vst.msk [vmem:[%s330_s21] sm:$0x1] %vm1674_vm15, %v1672_v1 }
 0x3db PF: > { %s21_s11 = sadd.s32 1, %s2017_s11  }
 0x3dc   : > { %p18_p4 = scmp.ge.s32.totalorder %s21_s11, 4  }
 0x3de   :  { %20 = sbr.rel (!%p18_p4) target bundleno = 3 (0x3), region = 86 }

</bundles_post_ra>
